<compile_context>
chip_gen: v7x
topology: tpu7x:2x2x1
jax: 0.10.0
libtpu: 0.0.40
codegen_flags: <defaults>
</compile_context>

<pallas_src>
import functools

import numpy as np
import jax
import jax.numpy as jnp
from jax.experimental import pallas as pl
from jax.experimental.pallas import tpu as pltpu


# ----------------------------------------------------------------------------
# Pallas kernel: per-(batch, query-tile) partial sums for all losses.
# ----------------------------------------------------------------------------
def criterion_kernel(logits_ref, tclass_ref, boxes_ref, out_ref, *,
                     no_obj, num_queries, eos_coef):
    qi = pl.program_id(1)

    logits = logits_ref[...]    # (1, TQ, Cp)  f32, classes on lanes
    tclass = tclass_ref[...]    # (1, TQ, 1)   int32
    boxes = boxes_ref[...]      # (1, 8, TQ)   f32 (src rows 0-3, tgt rows 4-7)

    _, TQ, Cp = logits.shape

    # --- masks derived in-kernel (no extra input streams) --------------------
    q_iota = jax.lax.broadcasted_iota(jnp.int32, (1, TQ, 1), 1) + qi * TQ
    valid = (q_iota < num_queries).astype(jnp.float32)             # real query?
    mask_s = (tclass != no_obj).astype(jnp.float32)                # matched?
    # empty_weight = 1 for real classes, eos_coef for no-object; 0 on pads.
    wq = jnp.where(tclass == no_obj, eos_coef, 1.0) * valid        # (1,TQ,1)

    # --- weighted cross-entropy partials (F.cross_entropy with class weights)
    cls_iota = jax.lax.broadcasted_iota(jnp.int32, (1, TQ, Cp), 2)
    onehot = (cls_iota == tclass).astype(jnp.float32)              # (1,TQ,Cp)

    maxl = jnp.max(logits, axis=-1, keepdims=True)                 # (1,TQ,1)
    sumexp = jnp.sum(jnp.exp(logits - maxl), axis=-1, keepdims=True)
    lse = jnp.log(sumexp) + maxl
    logit_t = jnp.sum(logits * onehot, axis=-1, keepdims=True)     # (1,TQ,1)
    nll = lse - logit_t
    wnll_sum = jnp.sum(wq * nll)
    w_sum = jnp.sum(wq)

    # --- argmax over classes (first occurrence, torch semantics); reuse maxl
    is_max = logits == maxl
    argmax_idx = jnp.min(jnp.where(is_max, cls_iota, Cp + 1),
                         axis=-1, keepdims=True)                   # (1,TQ,1)
    correct_sum = jnp.sum((argmax_idx == tclass).astype(jnp.float32) * mask_s)
    card_sum = jnp.sum((argmax_idx != no_obj).astype(jnp.float32) * valid)
    nmatch_sum = jnp.sum(mask_s)

    # --- box L1 partial (unmatched/padded slots carry identical "safe" boxes
    #     for src & tgt, so their contribution is exactly zero: no mask needed)
    sb = boxes[:, 0:4, :]
    tb = boxes[:, 4:8, :]
    l1_sum = jnp.sum(jnp.abs(sb - tb))

    # --- GIoU partial (cxcywh -> xyxy on coordinate planes, Q on lanes)
    def to_xyxy(b):
        cx, cy = b[:, 0:1, :], b[:, 1:2, :]
        ww, hh = b[:, 2:3, :], b[:, 3:4, :]
        return cx - 0.5 * ww, cy - 0.5 * hh, cx + 0.5 * ww, cy + 0.5 * hh

    sx0, sy0, sx1, sy1 = to_xyxy(sb)
    tx0, ty0, tx1, ty1 = to_xyxy(tb)
    iw = jnp.maximum(jnp.minimum(sx1, tx1) - jnp.maximum(sx0, tx0), 0.0)
    ih = jnp.maximum(jnp.minimum(sy1, ty1) - jnp.maximum(sy0, ty0), 0.0)
    inter = iw * ih
    area_s = (sx1 - sx0) * (sy1 - sy0)
    area_t = (tx1 - tx0) * (ty1 - ty0)
    union = area_s + area_t - inter
    enc = (jnp.maximum(sx1, tx1) - jnp.minimum(sx0, tx0)) * \
          (jnp.maximum(sy1, ty1) - jnp.minimum(sy0, ty0))
    iou = jnp.where(union > 0.0,
                    inter / jnp.where(union > 0.0, union, 1.0), 0.0)
    gterm = jnp.where(enc > 0.0,
                      (enc - union) / jnp.where(enc > 0.0, enc, 1.0), 0.0)
    giou = iou - gterm
    giou_sum = jnp.sum(1.0 - giou)   # identical safe boxes -> giou == 1 -> 0

    # --- stack the 7 scalar partials onto output lanes -----------------------
    lane = jax.lax.broadcasted_iota(jnp.int32, (1, 1, 128), 2)
    partial = (jnp.where(lane == 0, wnll_sum, 0.0)
               + jnp.where(lane == 1, w_sum, 0.0)
               + jnp.where(lane == 2, correct_sum, 0.0)
               + jnp.where(lane == 3, card_sum, 0.0)
               + jnp.where(lane == 4, nmatch_sum, 0.0)
               + jnp.where(lane == 5, l1_sum, 0.0)
               + jnp.where(lane == 6, giou_sum, 0.0))

    @pl.when(qi == 0)
    def _():
        out_ref[...] = jnp.zeros_like(out_ref)

    out_ref[...] += partial


# ----------------------------------------------------------------------------
# Wrapper: layout packing / padding, pallas_call, and the final scalar math.
# ----------------------------------------------------------------------------
def set_criterion_losses(pred_logits, pred_boxes, target_classes,
                         tgt_boxes_scat, eos_coef, num_classes, tq=128):
    B, Q, C1 = pred_logits.shape
    assert C1 == num_classes + 1
    no_obj = num_classes
    NEG = -1e30

    Cp = ((C1 + 127) // 128) * 128          # lane-dense class dim
    Qp = ((Q + tq - 1) // tq) * tq          # lane-dense query dim
    n_qt = Qp // tq

    # logits: single constant pad (padded class lanes and padded query rows);
    # padded query rows are neutralised in-kernel via the validity iota.
    logits = jnp.pad(pred_logits.astype(jnp.float32),
                     ((0, 0), (0, Qp - Q), (0, Cp - C1)), constant_values=NEG)

    tcls = target_classes.astype(jnp.int32)
    tclass = jnp.pad(tcls, ((0, 0), (0, Qp - Q)),
                     constant_values=no_obj)[..., None]            # (B,Qp,1)

    # boxes: unmatched / padded slots get an identical "safe" box for both src
    # and tgt so their L1 and (1 - GIoU) contributions are exactly zero.
    safe = jnp.asarray([0.5, 0.5, 1.0, 1.0], jnp.float32)
    matched = (tcls != no_obj)[..., None]                          # (B,Q,1)
    sb = jnp.where(matched, pred_boxes.astype(jnp.float32), safe)
    tb = jnp.where(matched, tgt_boxes_scat.astype(jnp.float32), safe)
    if Qp > Q:
        pad_box = jnp.broadcast_to(safe, (B, Qp - Q, 4))
        sb = jnp.concatenate([sb, pad_box], axis=1)
        tb = jnp.concatenate([tb, pad_box], axis=1)
    boxes = jnp.concatenate([jnp.transpose(sb, (0, 2, 1)),
                             jnp.transpose(tb, (0, 2, 1))], axis=1)  # (B,8,Qp)

    kernel = functools.partial(criterion_kernel, no_obj=no_obj,
                               num_queries=Q, eos_coef=float(eos_coef))

    partials = pl.pallas_call(
        kernel,
        out_shape=jax.ShapeDtypeStruct((B, 1, 128), jnp.float32),
        grid_spec=pltpu.PrefetchScalarGridSpec(
            num_scalar_prefetch=0,
            grid=(B, n_qt),
            in_specs=[
                pl.BlockSpec((1, tq, Cp), lambda b, qi: (b, qi, 0)),
                pl.BlockSpec((1, tq, 1), lambda b, qi: (b, qi, 0)),
                pl.BlockSpec((1, 8, tq), lambda b, qi: (b, 0, qi)),
            ],
            out_specs=pl.BlockSpec((1, 1, 128), lambda b, qi: (b, 0, 0)),
        ),
        compiler_params=pltpu.CompilerParams(
            dimension_semantics=("parallel", "arbitrary")),
    )(logits, tclass, boxes)
    # TODO(synk): the DETR aux-decoder losses could be fused here by adding a
    # leading "layer" grid axis instead of separate pallas_call launches.

    p = partials[:, 0, :]                       # (B, 128)
    wnll = jnp.sum(p[:, 0])
    wsum = jnp.sum(p[:, 1])
    correct = jnp.sum(p[:, 2])
    card_pred = p[:, 3]
    tgt_len = p[:, 4]
    nmatch = jnp.sum(p[:, 4])
    l1_sum = jnp.sum(p[:, 5])
    giou_sum = jnp.sum(p[:, 6])

    # TODO(synk): under data parallelism DETR all-reduces num_boxes across
    # devices before normalizing; here it is the local count (clamped >= 1).
    num_boxes = jnp.maximum(nmatch, 1.0)
    loss_ce = wnll / wsum
    class_error = 100.0 - 100.0 * correct / jnp.maximum(nmatch, 1.0)
    card_err = jnp.mean(jnp.abs(card_pred - tgt_len))
    loss_bbox = l1_sum / num_boxes
    loss_giou = giou_sum / num_boxes
    return {
        'loss_ce': loss_ce,
        'class_error': class_error,
        'cardinality_error': card_err,
        'loss_bbox': loss_bbox,
        'loss_giou': loss_giou,
    }


# ----------------------------------------------------------------------------
# Host-side glue: surrogate matcher + scatter of matched targets.
# TODO(synk): Hungarian matching (scipy.optimize.linear_sum_assignment) is a
# host-side combinatorial algorithm in the original DETR code and has no clean
# Pallas equivalent; a deterministic greedy matcher is used here instead.
# ----------------------------------------------------------------------------
def greedy_matcher(pred_logits, pred_boxes, tgt_labels, tgt_boxes):
    logits = np.asarray(pred_logits, np.float64)
    probs = np.exp(logits - logits.max(-1, keepdims=True))
    probs /= probs.sum(-1, keepdims=True)
    boxes = np.asarray(pred_boxes, np.float64)
    indices = []
    for b, (labels, tboxes) in enumerate(zip(tgt_labels, tgt_boxes)):
        cost = (-probs[b][:, labels]
                + np.abs(boxes[b][:, None, :] - tboxes[None, :, :]).sum(-1))
        src_used = set()
        src_idx, tgt_idx = [], []
        for j in range(len(labels)):
            order = np.argsort(cost[:, j], kind='stable')
            q = next(q for q in order if q not in src_used)
            src_used.add(int(q))
            src_idx.append(int(q))
            tgt_idx.append(j)
        indices.append((np.array(src_idx), np.array(tgt_idx)))
    return indices


def build_dense_targets(indices, tgt_labels, tgt_boxes, B, Q, num_classes):
    target_classes = np.full((B, Q), num_classes, np.int32)
    match_mask = np.zeros((B, Q), np.float32)
    tgt_boxes_scat = np.zeros((B, Q, 4), np.float32)
    for b, (src, tgt) in enumerate(indices):
        for s, t in zip(src, tgt):
            target_classes[b, s] = tgt_labels[b][t]
            match_mask[b, s] = 1.0
            tgt_boxes_scat[b, s] = tgt_boxes[b][t]
    return target_classes, match_mask, tgt_boxes_scat


def reference_losses(logits, boxes, tclass, tboxes, mask, empty_w, num_classes):
    logits = np.asarray(logits, np.float64)
    boxes = np.asarray(boxes, np.float64)
    B, Q, C1 = logits.shape
    onehot = np.eye(C1)[tclass]
    lse = np.log(np.exp(logits - logits.max(-1, keepdims=True)).sum(-1)) + logits.max(-1)
    logit_t = (logits * onehot).sum(-1)
    w = (np.asarray(empty_w).reshape(-1) * onehot).sum(-1)
    loss_ce = (w * (lse - logit_t)).sum() / w.sum()
    pred = logits.argmax(-1)
    nmatch = mask.sum()
    class_error = 100.0 - ((pred == tclass) * mask).sum() * 100.0 / nmatch
    card_pred = (pred != num_classes).sum(1)
    card_err = np.abs(card_pred - mask.sum(1)).mean()
    loss_bbox = (np.abs(boxes - tboxes).sum(-1) * mask).sum() / nmatch

    def xyxy(b):
        return (b[..., 0] - b[..., 2] / 2, b[..., 1] - b[..., 3] / 2,
                b[..., 0] + b[..., 2] / 2, b[..., 1] + b[..., 3] / 2)
    sx0, sy0, sx1, sy1 = xyxy(boxes)
    tx0, ty0, tx1, ty1 = xyxy(np.asarray(tboxes, np.float64))
    iw = np.maximum(np.minimum(sx1, tx1) - np.maximum(sx0, tx0), 0)
    ih = np.maximum(np.minimum(sy1, ty1) - np.maximum(sy0, ty0), 0)
    inter = iw * ih
    union = (sx1 - sx0) * (sy1 - sy0) + (tx1 - tx0) * (ty1 - ty0) - inter
    enc = (np.maximum(sx1, tx1) - np.minimum(sx0, tx0)) * \
          (np.maximum(sy1, ty1) - np.minimum(sy0, ty0))
    with np.errstate(divide='ignore', invalid='ignore'):
        iou = np.where(union > 0, inter / np.where(union > 0, union, 1.0), 0.0)
        gterm = np.where(enc > 0, (enc - union) / np.where(enc > 0, enc, 1.0), 0.0)
    giou = iou - gterm
    loss_giou = ((1 - giou) * mask).sum() / nmatch
    return dict(loss_ce=loss_ce, class_error=class_error,
                cardinality_error=card_err, loss_bbox=loss_bbox,
                loss_giou=loss_giou)


if __name__ == "__main__":
    B, Q, num_classes = 2, 8, 4
    C1 = num_classes + 1
    eos_coef = 0.1

    key = jax.random.PRNGKey(0)
    k1, k2, k3 = jax.random.split(key, 3)

    pred_logits = jax.random.normal(k1, (B, Q, C1), jnp.float32)
    pred_boxes = jax.nn.sigmoid(jax.random.normal(k2, (B, Q, 4), jnp.float32))

    # synthetic targets: 3 objects in image 0, 2 in image 1
    n_per_image = [3, 2]
    tgt_labels, tgt_boxes = [], []
    kk = k3
    for n in n_per_image:
        kk, ka, kb = jax.random.split(kk, 3)
        tgt_labels.append(np.asarray(
            jax.random.randint(ka, (n,), 0, num_classes), np.int32))
        cxcy = np.asarray(jax.random.uniform(kb, (n, 2), jnp.float32,
                                             minval=0.2, maxval=0.8))
        wh = np.full((n, 2), 0.2, np.float32)
        tgt_boxes.append(np.concatenate([cxcy, wh], axis=1).astype(np.float32))

    indices = greedy_matcher(pred_logits, pred_boxes, tgt_labels, tgt_boxes)
    target_classes, match_mask, tgt_boxes_scat = build_dense_targets(
        indices, tgt_labels, tgt_boxes, B, Q, num_classes)

    empty_weight = np.ones((C1,), np.float32)
    empty_weight[-1] = eos_coef

    losses = set_criterion_losses(
        pred_logits, pred_boxes,
        jnp.asarray(target_classes), jnp.asarray(tgt_boxes_scat),
        eos_coef=eos_coef, num_classes=num_classes)
    losses = jax.tree_util.tree_map(jax.block_until_ready, losses)

    ref = reference_losses(pred_logits, pred_boxes, target_classes,
                           tgt_boxes_scat, match_mask, empty_weight,
                           num_classes)
    for k in ref:
        np.testing.assert_allclose(np.asarray(losses[k]), ref[k],
                                   rtol=1e-4, atol=1e-4)

    print("KERNEL_OK")
</pallas_src>

<mosaic_0001>
module attributes {stable_mosaic.version = 11 : i64} {
  func.func @criterion_kernel(%arg0: i32, %arg1: i32, %arg2: memref<1x128x128xf32, #tpu.memory_space<vmem>>, %arg3: memref<1x128x1xi32, #tpu.memory_space<vmem>>, %arg4: memref<1x8x128xf32, #tpu.memory_space<vmem>>, %arg5: memref<1x1x128xf32, #tpu.memory_space<vmem>>) attributes {dimension_semantics = [#tpu.dimension_semantics<parallel>, #tpu.dimension_semantics<arbitrary>], iteration_bounds = array<i64: 2, 1>, scalar_prefetch = 0 : i64, scratch_operands = 0 : i64, tpu.core_type = #tpu.core_type<tc>, window_params = [{transform_indices = @transform_0, window_bounds = array<i64: 1, 128, 128>}, {transform_indices = @transform_1, window_bounds = array<i64: 1, 128, 1>}, {transform_indices = @transform_2, window_bounds = array<i64: 1, 8, 128>}, {transform_indices = @transform_3, window_bounds = array<i64: 1, 1, 128>}]} {
    %c0 = arith.constant 0 : index
    %c0_0 = arith.constant 0 : index
    %c0_1 = arith.constant 0 : index
    %0 = vector.load %arg2[%c0, %c0_0, %c0_1] : memref<1x128x128xf32, #tpu.memory_space<vmem>>, vector<1x128x128xf32>
    %c0_2 = arith.constant 0 : index
    %c0_3 = arith.constant 0 : index
    %c0_4 = arith.constant 0 : index
    %1 = vector.load %arg3[%c0_2, %c0_3, %c0_4] : memref<1x128x1xi32, #tpu.memory_space<vmem>>, vector<1x128x1xi32>
    %c0_5 = arith.constant 0 : index
    %c0_6 = arith.constant 0 : index
    %c0_7 = arith.constant 0 : index
    %2 = vector.load %arg4[%c0_5, %c0_6, %c0_7] : memref<1x8x128xf32, #tpu.memory_space<vmem>>, vector<1x8x128xf32>
    %3 = tpu.iota {dimensions = array<i32: 1>} : vector<1x128x1xi32>
    %c128_i32 = arith.constant 128 : i32
    %4 = arith.muli %arg1, %c128_i32 : i32
    %5 = vector.broadcast %4 : i32 to vector<1x128x1xi32>
    %6 = arith.addi %3, %5 : vector<1x128x1xi32>
    %c8_i32 = arith.constant 8 : i32
    %7 = vector.broadcast %c8_i32 : i32 to vector<1x128x1xi32>
    %8 = arith.cmpi slt, %6, %7 : vector<1x128x1xi32>
    %9 = arith.extui %8 : vector<1x128x1xi1> to vector<1x128x1xi32>
    %10 = arith.sitofp %9 : vector<1x128x1xi32> to vector<1x128x1xf32>
    %c4_i32 = arith.constant 4 : i32
    %11 = vector.broadcast %c4_i32 : i32 to vector<1x128x1xi32>
    %12 = arith.cmpi ne, %1, %11 : vector<1x128x1xi32>
    %13 = arith.extui %12 : vector<1x128x1xi1> to vector<1x128x1xi32>
    %14 = arith.sitofp %13 : vector<1x128x1xi32> to vector<1x128x1xf32>
    %c4_i32_8 = arith.constant 4 : i32
    %15 = vector.broadcast %c4_i32_8 : i32 to vector<1x128x1xi32>
    %16 = arith.cmpi eq, %1, %15 : vector<1x128x1xi32>
    %cst = arith.constant 1.000000e-01 : f32
    %cst_9 = arith.constant 1.000000e+00 : f32
    %17 = vector.broadcast %cst : f32 to vector<1x128x1xf32>
    %18 = vector.broadcast %cst_9 : f32 to vector<1x128x1xf32>
    %19 = arith.select %16, %17, %18 : vector<1x128x1xi1>, vector<1x128x1xf32>
    %20 = arith.mulf %19, %10 : vector<1x128x1xf32>
    %21 = tpu.iota {dimensions = array<i32: 2>} : vector<1x128x128xi32>
    %22 = vector.broadcast %1 : vector<1x128x1xi32> to vector<1x128x128xi32>
    %23 = arith.cmpi eq, %21, %22 : vector<1x128x128xi32>
    %24 = arith.extui %23 : vector<1x128x128xi1> to vector<1x128x128xi32>
    %25 = arith.sitofp %24 : vector<1x128x128xi32> to vector<1x128x128xf32>
    %cst_10 = arith.constant dense<0xFF800000> : vector<1x128xf32>
    %26 = vector.multi_reduction <maximumf>, %0, %cst_10 [2] : vector<1x128x128xf32> to vector<1x128xf32>
    %27 = vector.shape_cast %26 : vector<1x128xf32> to vector<1x128x1xf32>
    %28 = vector.broadcast %27 : vector<1x128x1xf32> to vector<1x128x128xf32>
    %29 = arith.subf %0, %28 : vector<1x128x128xf32>
    %30 = math.exp %29 : vector<1x128x128xf32>
    %cst_11 = arith.constant dense<0.000000e+00> : vector<1x128xf32>
    %31 = vector.multi_reduction <add>, %30, %cst_11 [2] : vector<1x128x128xf32> to vector<1x128xf32>
    %32 = vector.shape_cast %31 : vector<1x128xf32> to vector<1x128x1xf32>
    %33 = math.log %32 : vector<1x128x1xf32>
    %34 = arith.addf %33, %27 : vector<1x128x1xf32>
    %35 = arith.mulf %0, %25 : vector<1x128x128xf32>
    %cst_12 = arith.constant dense<0.000000e+00> : vector<1x128xf32>
    %36 = vector.multi_reduction <add>, %35, %cst_12 [2] : vector<1x128x128xf32> to vector<1x128xf32>
    %37 = vector.shape_cast %36 : vector<1x128xf32> to vector<1x128x1xf32>
    %38 = arith.subf %34, %37 : vector<1x128x1xf32>
    %39 = arith.mulf %20, %38 : vector<1x128x1xf32>
    %40 = vector.shape_cast %39 : vector<1x128x1xf32> to vector<1x1x128x1xf32>
    %cst_13 = arith.constant dense<0.000000e+00> : vector<1xf32>
    %41 = vector.multi_reduction <add>, %40, %cst_13 [1, 2, 3] : vector<1x1x128x1xf32> to vector<1xf32>
    %42 = vector.shape_cast %41 : vector<1xf32> to vector<1x1x1x1xf32>
    %43 = vector.extract %42[0, 0, 0, 0] : f32 from vector<1x1x1x1xf32>
    %44 = vector.shape_cast %20 : vector<1x128x1xf32> to vector<1x1x128x1xf32>
    %cst_14 = arith.constant dense<0.000000e+00> : vector<1xf32>
    %45 = vector.multi_reduction <add>, %44, %cst_14 [1, 2, 3] : vector<1x1x128x1xf32> to vector<1xf32>
    %46 = vector.shape_cast %45 : vector<1xf32> to vector<1x1x1x1xf32>
    %47 = vector.extract %46[0, 0, 0, 0] : f32 from vector<1x1x1x1xf32>
    %48 = vector.broadcast %27 : vector<1x128x1xf32> to vector<1x128x128xf32>
    %49 = arith.cmpf oeq, %0, %48 : vector<1x128x128xf32>
    %c129_i32 = arith.constant 129 : i32
    %50 = vector.broadcast %c129_i32 : i32 to vector<1x128x128xi32>
    %51 = arith.select %49, %21, %50 : vector<1x128x128xi1>, vector<1x128x128xi32>
    %cst_15 = arith.constant dense<2147483647> : vector<1x128xi32>
    %52 = vector.multi_reduction <minsi>, %51, %cst_15 [2] : vector<1x128x128xi32> to vector<1x128xi32>
    %53 = vector.shape_cast %52 : vector<1x128xi32> to vector<1x128x1xi32>
    %54 = arith.cmpi eq, %53, %1 : vector<1x128x1xi32>
    %55 = arith.extui %54 : vector<1x128x1xi1> to vector<1x128x1xi32>
    %56 = arith.sitofp %55 : vector<1x128x1xi32> to vector<1x128x1xf32>
    %57 = arith.mulf %56, %14 : vector<1x128x1xf32>
    %58 = vector.shape_cast %57 : vector<1x128x1xf32> to vector<1x1x128x1xf32>
    %cst_16 = arith.constant dense<0.000000e+00> : vector<1xf32>
    %59 = vector.multi_reduction <add>, %58, %cst_16 [1, 2, 3] : vector<1x1x128x1xf32> to vector<1xf32>
    %60 = vector.shape_cast %59 : vector<1xf32> to vector<1x1x1x1xf32>
    %61 = vector.extract %60[0, 0, 0, 0] : f32 from vector<1x1x1x1xf32>
    %c4_i32_17 = arith.constant 4 : i32
    %62 = vector.broadcast %c4_i32_17 : i32 to vector<1x128x1xi32>
    %63 = arith.cmpi ne, %53, %62 : vector<1x128x1xi32>
    %64 = arith.extui %63 : vector<1x128x1xi1> to vector<1x128x1xi32>
    %65 = arith.sitofp %64 : vector<1x128x1xi32> to vector<1x128x1xf32>
    %66 = arith.mulf %65, %10 : vector<1x128x1xf32>
    %67 = vector.shape_cast %66 : vector<1x128x1xf32> to vector<1x1x128x1xf32>
    %cst_18 = arith.constant dense<0.000000e+00> : vector<1xf32>
    %68 = vector.multi_reduction <add>, %67, %cst_18 [1, 2, 3] : vector<1x1x128x1xf32> to vector<1xf32>
    %69 = vector.shape_cast %68 : vector<1xf32> to vector<1x1x1x1xf32>
    %70 = vector.extract %69[0, 0, 0, 0] : f32 from vector<1x1x1x1xf32>
    %71 = vector.shape_cast %14 : vector<1x128x1xf32> to vector<1x1x128x1xf32>
    %cst_19 = arith.constant dense<0.000000e+00> : vector<1xf32>
    %72 = vector.multi_reduction <add>, %71, %cst_19 [1, 2, 3] : vector<1x1x128x1xf32> to vector<1xf32>
    %73 = vector.shape_cast %72 : vector<1xf32> to vector<1x1x1x1xf32>
    %74 = vector.extract %73[0, 0, 0, 0] : f32 from vector<1x1x1x1xf32>
    %75 = vector.extract_strided_slice %2 {offsets = [0, 0, 0], sizes = [1, 4, 128], strides = [1, 1, 1]} : vector<1x8x128xf32> to vector<1x4x128xf32>
    %76 = vector.extract_strided_slice %2 {offsets = [0, 4, 0], sizes = [1, 4, 128], strides = [1, 1, 1]} : vector<1x8x128xf32> to vector<1x4x128xf32>
    %77 = arith.subf %75, %76 : vector<1x4x128xf32>
    %78 = math.absf %77 : vector<1x4x128xf32>
    %79 = vector.shape_cast %78 : vector<1x4x128xf32> to vector<1x1x4x128xf32>
    %cst_20 = arith.constant dense<0.000000e+00> : vector<1xf32>
    %80 = vector.multi_reduction <add>, %79, %cst_20 [1, 2, 3] : vector<1x1x4x128xf32> to vector<1xf32>
    %81 = vector.shape_cast %80 : vector<1xf32> to vector<1x1x1x1xf32>
    %82 = vector.extract %81[0, 0, 0, 0] : f32 from vector<1x1x1x1xf32>
    %83 = vector.extract_strided_slice %75 {offsets = [0, 0, 0], sizes = [1, 1, 128], strides = [1, 1, 1]} : vector<1x4x128xf32> to vector<1x1x128xf32>
    %84 = vector.extract_strided_slice %75 {offsets = [0, 1, 0], sizes = [1, 1, 128], strides = [1, 1, 1]} : vector<1x4x128xf32> to vector<1x1x128xf32>
    %85 = vector.extract_strided_slice %75 {offsets = [0, 2, 0], sizes = [1, 1, 128], strides = [1, 1, 1]} : vector<1x4x128xf32> to vector<1x1x128xf32>
    %86 = vector.extract_strided_slice %75 {offsets = [0, 3, 0], sizes = [1, 1, 128], strides = [1, 1, 1]} : vector<1x4x128xf32> to vector<1x1x128xf32>
    %cst_21 = arith.constant 5.000000e-01 : f32
    %87 = vector.broadcast %cst_21 : f32 to vector<1x1x128xf32>
    %88 = arith.mulf %87, %85 : vector<1x1x128xf32>
    %89 = arith.subf %83, %88 : vector<1x1x128xf32>
    %cst_22 = arith.constant 5.000000e-01 : f32
    %90 = vector.broadcast %cst_22 : f32 to vector<1x1x128xf32>
    %91 = arith.mulf %90, %86 : vector<1x1x128xf32>
    %92 = arith.subf %84, %91 : vector<1x1x128xf32>
    %cst_23 = arith.constant 5.000000e-01 : f32
    %93 = vector.broadcast %cst_23 : f32 to vector<1x1x128xf32>
    %94 = arith.mulf %93, %85 : vector<1x1x128xf32>
    %95 = arith.addf %83, %94 : vector<1x1x128xf32>
    %cst_24 = arith.constant 5.000000e-01 : f32
    %96 = vector.broadcast %cst_24 : f32 to vector<1x1x128xf32>
    %97 = arith.mulf %96, %86 : vector<1x1x128xf32>
    %98 = arith.addf %84, %97 : vector<1x1x128xf32>
    %99 = vector.extract_strided_slice %76 {offsets = [0, 0, 0], sizes = [1, 1, 128], strides = [1, 1, 1]} : vector<1x4x128xf32> to vector<1x1x128xf32>
    %100 = vector.extract_strided_slice %76 {offsets = [0, 1, 0], sizes = [1, 1, 128], strides = [1, 1, 1]} : vector<1x4x128xf32> to vector<1x1x128xf32>
    %101 = vector.extract_strided_slice %76 {offsets = [0, 2, 0], sizes = [1, 1, 128], strides = [1, 1, 1]} : vector<1x4x128xf32> to vector<1x1x128xf32>
    %102 = vector.extract_strided_slice %76 {offsets = [0, 3, 0], sizes = [1, 1, 128], strides = [1, 1, 1]} : vector<1x4x128xf32> to vector<1x1x128xf32>
    %cst_25 = arith.constant 5.000000e-01 : f32
    %103 = vector.broadcast %cst_25 : f32 to vector<1x1x128xf32>
    %104 = arith.mulf %103, %101 : vector<1x1x128xf32>
    %105 = arith.subf %99, %104 : vector<1x1x128xf32>
    %cst_26 = arith.constant 5.000000e-01 : f32
    %106 = vector.broadcast %cst_26 : f32 to vector<1x1x128xf32>
    %107 = arith.mulf %106, %102 : vector<1x1x128xf32>
    %108 = arith.subf %100, %107 : vector<1x1x128xf32>
    %cst_27 = arith.constant 5.000000e-01 : f32
    %109 = vector.broadcast %cst_27 : f32 to vector<1x1x128xf32>
    %110 = arith.mulf %109, %101 : vector<1x1x128xf32>
    %111 = arith.addf %99, %110 : vector<1x1x128xf32>
    %cst_28 = arith.constant 5.000000e-01 : f32
    %112 = vector.broadcast %cst_28 : f32 to vector<1x1x128xf32>
    %113 = arith.mulf %112, %102 : vector<1x1x128xf32>
    %114 = arith.addf %100, %113 : vector<1x1x128xf32>
    %115 = arith.minimumf %95, %111 : vector<1x1x128xf32>
    %116 = arith.maximumf %89, %105 : vector<1x1x128xf32>
    %117 = arith.subf %115, %116 : vector<1x1x128xf32>
    %cst_29 = arith.constant 0.000000e+00 : f32
    %118 = vector.broadcast %cst_29 : f32 to vector<1x1x128xf32>
    %119 = arith.maximumf %117, %118 : vector<1x1x128xf32>
    %120 = arith.minimumf %98, %114 : vector<1x1x128xf32>
    %121 = arith.maximumf %92, %108 : vector<1x1x128xf32>
    %122 = arith.subf %120, %121 : vector<1x1x128xf32>
    %cst_30 = arith.constant 0.000000e+00 : f32
    %123 = vector.broadcast %cst_30 : f32 to vector<1x1x128xf32>
    %124 = arith.maximumf %122, %123 : vector<1x1x128xf32>
    %125 = arith.mulf %119, %124 : vector<1x1x128xf32>
    %126 = arith.subf %95, %89 : vector<1x1x128xf32>
    %127 = arith.subf %98, %92 : vector<1x1x128xf32>
    %128 = arith.mulf %126, %127 : vector<1x1x128xf32>
    %129 = arith.subf %111, %105 : vector<1x1x128xf32>
    %130 = arith.subf %114, %108 : vector<1x1x128xf32>
    %131 = arith.mulf %129, %130 : vector<1x1x128xf32>
    %132 = arith.addf %128, %131 : vector<1x1x128xf32>
    %133 = arith.subf %132, %125 : vector<1x1x128xf32>
    %134 = arith.maximumf %95, %111 : vector<1x1x128xf32>
    %135 = arith.minimumf %89, %105 : vector<1x1x128xf32>
    %136 = arith.subf %134, %135 : vector<1x1x128xf32>
    %137 = arith.maximumf %98, %114 : vector<1x1x128xf32>
    %138 = arith.minimumf %92, %108 : vector<1x1x128xf32>
    %139 = arith.subf %137, %138 : vector<1x1x128xf32>
    %140 = arith.mulf %136, %139 : vector<1x1x128xf32>
    %cst_31 = arith.constant 0.000000e+00 : f32
    %141 = vector.broadcast %cst_31 : f32 to vector<1x1x128xf32>
    %142 = arith.cmpf ogt, %133, %141 : vector<1x1x128xf32>
    %cst_32 = arith.constant 0.000000e+00 : f32
    %143 = vector.broadcast %cst_32 : f32 to vector<1x1x128xf32>
    %144 = arith.cmpf ogt, %133, %143 : vector<1x1x128xf32>
    %cst_33 = arith.constant 1.000000e+00 : f32
    %145 = vector.broadcast %cst_33 : f32 to vector<1x1x128xf32>
    %146 = arith.select %144, %133, %145 : vector<1x1x128xi1>, vector<1x1x128xf32>
    %147 = arith.divf %125, %146 : vector<1x1x128xf32>
    %cst_34 = arith.constant 0.000000e+00 : f32
    %148 = vector.broadcast %cst_34 : f32 to vector<1x1x128xf32>
    %149 = arith.select %142, %147, %148 : vector<1x1x128xi1>, vector<1x1x128xf32>
    %cst_35 = arith.constant 0.000000e+00 : f32
    %150 = vector.broadcast %cst_35 : f32 to vector<1x1x128xf32>
    %151 = arith.cmpf ogt, %140, %150 : vector<1x1x128xf32>
    %152 = arith.subf %140, %133 : vector<1x1x128xf32>
    %cst_36 = arith.constant 0.000000e+00 : f32
    %153 = vector.broadcast %cst_36 : f32 to vector<1x1x128xf32>
    %154 = arith.cmpf ogt, %140, %153 : vector<1x1x128xf32>
    %cst_37 = arith.constant 1.000000e+00 : f32
    %155 = vector.broadcast %cst_37 : f32 to vector<1x1x128xf32>
    %156 = arith.select %154, %140, %155 : vector<1x1x128xi1>, vector<1x1x128xf32>
    %157 = arith.divf %152, %156 : vector<1x1x128xf32>
    %cst_38 = arith.constant 0.000000e+00 : f32
    %158 = vector.broadcast %cst_38 : f32 to vector<1x1x128xf32>
    %159 = arith.select %151, %157, %158 : vector<1x1x128xi1>, vector<1x1x128xf32>
    %160 = arith.subf %149, %159 : vector<1x1x128xf32>
    %cst_39 = arith.constant 1.000000e+00 : f32
    %161 = vector.broadcast %cst_39 : f32 to vector<1x1x128xf32>
    %162 = arith.subf %161, %160 : vector<1x1x128xf32>
    %163 = vector.shape_cast %162 : vector<1x1x128xf32> to vector<1x1x1x128xf32>
    %cst_40 = arith.constant dense<0.000000e+00> : vector<1xf32>
    %164 = vector.multi_reduction <add>, %163, %cst_40 [1, 2, 3] : vector<1x1x1x128xf32> to vector<1xf32>
    %165 = vector.shape_cast %164 : vector<1xf32> to vector<1x1x1x1xf32>
    %166 = vector.extract %165[0, 0, 0, 0] : f32 from vector<1x1x1x1xf32>
    %167 = tpu.iota {dimensions = array<i32: 2>} : vector<1x1x128xi32>
    %c0_i32 = arith.constant 0 : i32
    %168 = vector.broadcast %c0_i32 : i32 to vector<1x1x128xi32>
    %169 = arith.cmpi eq, %167, %168 : vector<1x1x128xi32>
    %cst_41 = arith.constant 0.000000e+00 : f32
    %170 = vector.broadcast %43 : f32 to vector<1x1x128xf32>
    %171 = vector.broadcast %cst_41 : f32 to vector<1x1x128xf32>
    %172 = arith.select %169, %170, %171 : vector<1x1x128xi1>, vector<1x1x128xf32>
    %c1_i32 = arith.constant 1 : i32
    %173 = vector.broadcast %c1_i32 : i32 to vector<1x1x128xi32>
    %174 = arith.cmpi eq, %167, %173 : vector<1x1x128xi32>
    %cst_42 = arith.constant 0.000000e+00 : f32
    %175 = vector.broadcast %47 : f32 to vector<1x1x128xf32>
    %176 = vector.broadcast %cst_42 : f32 to vector<1x1x128xf32>
    %177 = arith.select %174, %175, %176 : vector<1x1x128xi1>, vector<1x1x128xf32>
    %178 = arith.addf %172, %177 : vector<1x1x128xf32>
    %c2_i32 = arith.constant 2 : i32
    %179 = vector.broadcast %c2_i32 : i32 to vector<1x1x128xi32>
    %180 = arith.cmpi eq, %167, %179 : vector<1x1x128xi32>
    %cst_43 = arith.constant 0.000000e+00 : f32
    %181 = vector.broadcast %61 : f32 to vector<1x1x128xf32>
    %182 = vector.broadcast %cst_43 : f32 to vector<1x1x128xf32>
    %183 = arith.select %180, %181, %182 : vector<1x1x128xi1>, vector<1x1x128xf32>
    %184 = arith.addf %178, %183 : vector<1x1x128xf32>
    %c3_i32 = arith.constant 3 : i32
    %185 = vector.broadcast %c3_i32 : i32 to vector<1x1x128xi32>
    %186 = arith.cmpi eq, %167, %185 : vector<1x1x128xi32>
    %cst_44 = arith.constant 0.000000e+00 : f32
    %187 = vector.broadcast %70 : f32 to vector<1x1x128xf32>
    %188 = vector.broadcast %cst_44 : f32 to vector<1x1x128xf32>
    %189 = arith.select %186, %187, %188 : vector<1x1x128xi1>, vector<1x1x128xf32>
    %190 = arith.addf %184, %189 : vector<1x1x128xf32>
    %c4_i32_45 = arith.constant 4 : i32
    %191 = vector.broadcast %c4_i32_45 : i32 to vector<1x1x128xi32>
    %192 = arith.cmpi eq, %167, %191 : vector<1x1x128xi32>
    %cst_46 = arith.constant 0.000000e+00 : f32
    %193 = vector.broadcast %74 : f32 to vector<1x1x128xf32>
    %194 = vector.broadcast %cst_46 : f32 to vector<1x1x128xf32>
    %195 = arith.select %192, %193, %194 : vector<1x1x128xi1>, vector<1x1x128xf32>
    %196 = arith.addf %190, %195 : vector<1x1x128xf32>
    %c5_i32 = arith.constant 5 : i32
    %197 = vector.broadcast %c5_i32 : i32 to vector<1x1x128xi32>
    %198 = arith.cmpi eq, %167, %197 : vector<1x1x128xi32>
    %cst_47 = arith.constant 0.000000e+00 : f32
    %199 = vector.broadcast %82 : f32 to vector<1x1x128xf32>
    %200 = vector.broadcast %cst_47 : f32 to vector<1x1x128xf32>
    %201 = arith.select %198, %199, %200 : vector<1x1x128xi1>, vector<1x1x128xf32>
    %202 = arith.addf %196, %201 : vector<1x1x128xf32>
    %c6_i32 = arith.constant 6 : i32
    %203 = vector.broadcast %c6_i32 : i32 to vector<1x1x128xi32>
    %204 = arith.cmpi eq, %167, %203 : vector<1x1x128xi32>
    %cst_48 = arith.constant 0.000000e+00 : f32
    %205 = vector.broadcast %166 : f32 to vector<1x1x128xf32>
    %206 = vector.broadcast %cst_48 : f32 to vector<1x1x128xf32>
    %207 = arith.select %204, %205, %206 : vector<1x1x128xi1>, vector<1x1x128xf32>
    %208 = arith.addf %202, %207 : vector<1x1x128xf32>
    %c0_i32_49 = arith.constant 0 : i32
    %209 = arith.cmpi eq, %arg1, %c0_i32_49 : i32
    %210 = arith.extui %209 : i1 to i32
    %c0_i32_50 = arith.constant 0 : i32
    %211 = arith.cmpi ne, %210, %c0_i32_50 : i32
    scf.if %211 {
      %cst_57 = arith.constant 0.000000e+00 : f32
      %215 = vector.broadcast %cst_57 : f32 to vector<1x1x128xf32>
      %c0_58 = arith.constant 0 : index
      %c0_59 = arith.constant 0 : index
      %c0_60 = arith.constant 0 : index
      %216 = vector.load %arg5[%c0_58, %c0_59, %c0_60] : memref<1x1x128xf32, #tpu.memory_space<vmem>>, vector<1x1x128xf32>
      tpu.vector_store %arg5[%c0_58, %c0_59, %c0_60], %215 {strides = array<i32>} : memref<1x1x128xf32, #tpu.memory_space<vmem>>, vector<1x1x128xf32>,
    } else {
    }
    %c0_51 = arith.constant 0 : index
    %c0_52 = arith.constant 0 : index
    %c0_53 = arith.constant 0 : index
    %212 = vector.load %arg5[%c0_51, %c0_52, %c0_53] : memref<1x1x128xf32, #tpu.memory_space<vmem>>, vector<1x1x128xf32>
    %213 = arith.addf %212, %208 : vector<1x1x128xf32>
    %c0_54 = arith.constant 0 : index
    %c0_55 = arith.constant 0 : index
    %c0_56 = arith.constant 0 : index
    %214 = vector.load %arg5[%c0_54, %c0_55, %c0_56] : memref<1x1x128xf32, #tpu.memory_space<vmem>>, vector<1x1x128xf32>
    tpu.vector_store %arg5[%c0_54, %c0_55, %c0_56], %213 {strides = array<i32>} : memref<1x1x128xf32, #tpu.memory_space<vmem>>, vector<1x1x128xf32>,
    return
  }
  func.func @transform_0(%arg0: i32, %arg1: i32) -> (i32, i32, i32) {
    %c0_i32 = arith.constant 0 : i32
    %c0_i32_0 = arith.constant 0 : i32
    return %arg0, %arg1, %c0_i32 : i32, i32, i32
  }
  func.func @transform_1(%arg0: i32, %arg1: i32) -> (i32, i32, i32) {
    %c0_i32 = arith.constant 0 : i32
    %c0_i32_0 = arith.constant 0 : i32
    return %arg0, %arg1, %c0_i32 : i32, i32, i32
  }
  func.func @transform_2(%arg0: i32, %arg1: i32) -> (i32, i32, i32) {
    %c0_i32 = arith.constant 0 : i32
    %c0_i32_0 = arith.constant 0 : i32
    return %arg0, %c0_i32, %arg1 : i32, i32, i32
  }
  func.func @transform_3(%arg0: i32, %arg1: i32) -> (i32, i32, i32) {
    %c0_i32 = arith.constant 0 : i32
    %c0_i32_0 = arith.constant 0 : i32
    %c0_i32_1 = arith.constant 0 : i32
    return %arg0, %c0_i32, %c0_i32_0 : i32, i32, i32
  }
}

</mosaic_0001>

<bundles_post_ra>
// kernel: tpu_custom_call.1
= control target key start
LH: loop header
LB: loop body
LE: loop exit
PB: predicated region body
PF: predicated region fallthrough
CT: control target
= control target key end

     0   :  { %8 = vsyncpa [#allocation3], 0  ;;  %s3226_s0 = inlined_call_operand.vmem [shape: f32[2,128,128], index: 0, kind: input, shape index: {}]   ;;  %s3227_s1 = inlined_call_operand.vmem [shape: s32[2,128,1], index: 1, kind: input, shape index: {}]   ;;  %s3228_s2 = inlined_call_operand.hbm [shape: f32[2,8,128], index: 2, kind: input, shape index: {}]   ;;  %s3229_s3 = inlined_call_operand.hbm [shape: f32[2,1,128], index: 3, kind: output, shape index: {}]  }
   0x1   :  { %10 = vsyncpa [#allocation3 + $0x1], 0 }
   0x2   :  { %11 = vsyncpa [#allocation4], 0 }
   0x3   :  { %13 = vsyncpa [#allocation4 + $0x1], 0  ;;  %s2026_s12 = smov 0   ;;  %s2028_s13 = smov 0  }
   0x4   :  { %s2030_s14 = smov 0   ;;  %s2032_s15 = smov 0  }
   0x5   :  { %s2034_s16 = smov 0   ;;  %s2036_s17 = smov 0  }
   0x6 LB: > { %s1643_s18 = sadd.s32 4294967295, %s1999_s17   ;;  %s1644_s19 = sadd.s32 4294967294, %s1999_s17   ;;  %s1999_s17 = sphi %s2036_s17, %s19_s17   ;;  %s1995_s16 = sphi %s2034_s16, %s3433_s16   ;;  %s1991_s15 = sphi %s2032_s15, %s3432_s15   ;;  %s1987_s14 = sphi %s2030_s14, %s3431_s14   ;;  %s1983_s13 = sphi %s2028_s13, %s3430_s13   ;;  %s1979_s12 = sphi %s2026_s12, %s3429_s12  }
   0x7   : > { %s31_s20 = sadd.s32 1, %s1995_s16  ;;  %s96_s21 = sadd.s32 1, %s1987_s14 }
   0x8   : > { %p33_p0 = scmp.ge.s32.totalorder %s31_s20, 2  ;;  %p103_p1 = scmp.ne.s32.totalorder %s1987_s14, %s1983_s13 }
   0x9   : > { %p104_p2 = scmp.eq.s32.totalorder %s1999_s17, 0  ;;  %p109_p3 = scmp.ne.s32.totalorder %s1983_s13, %s1979_s12 }
   0xa   : > { %s3435_s20 = smov (%p33_p0, %s31_s20), 0  ;;  %p110_p5 = scmp.eq.s32.totalorder %s1643_s18, 0 }
   0xb   : > { %p2067_p4 = por %p104_p2, %p103_p1  ;;  %s91_s23 = ssub.s32 %s1995_s16, %s3435_s20 }
   0xc   : > { %p133_p6 = scmp.eq.s32.totalorder %s1643_s18, 1  ;;  %p94_p7 = scmp.eq.s32.totalorder %s91_s23, 0 }
   0xd   : > { %p2073_p8 = por %p110_p5, %p109_p3  ;;  %p139_p10 = scmp.eq.s32.totalorder %s1644_s19, 1 }
   0xe   : > { %p2077_p9 = por %p133_p6, %p103_p1  ;;  %p1750_p13 = scmp.lt.s32.totalorder %s1999_s17, 2 }
   0xf   : > { %s2082_s26 = scalar_select %p94_p7, %s1987_s14, %s96_s21  }
  0x10   : > { %s3303_s25 = scalar_select %p2077_p9, 1, 0 }
  0x11   : > { %p2084_p11 = por %p139_p10, %p109_p3  ;;  %s185_s28 = sand.u32 1, %s1987_s14  }
  0x12   : > { %s1647_s29 = sshll.u32 %s185_s28, 3  ;;  %s1648_s30 = sshll.u32 %s1995_s16, 7 }
  0x13   : > { %s3304_s27 = scalar_select %p2084_p11, 1, 0 }
  0x14   : > { %s2095_s6 = scalar_lea.hbm %s3228_s2, %s1648_s30  ;;  %s189_s7 = scalar_lea.vmem [#allocation2], %s1647_s29 }
  0x15   : > { %s197_s8 = sshll.u32 %s189_s7, 4  ;;  %p2101_p0 = pnand %p1750_p13, %p2067_p4  ;;  %s2097_s8 = int_to_ptr.vmem [resolvable:$true] %s197_s8 }
  0x16   : > { %s186_s10 = scalar_lea.sflag [#allocation3], %s185_s28  ;;  %s1887_s11 = scalar_lea.hbm %s2095_s6, 128 }
  0x17   : > { %p1888_p3 = scmp.ne.s32.totalorder %s2095_s6, %s1887_s11  ;;  %p1889_p5 = pneg %p2101_p0 }
  0x18   : > { %s1892_s21 = scalar_lea.hbm %s3228_s2, 256  ;;  %p1893_p4 = scmp.lt.u32.totalorder %s2095_s6, %s3228_s2 }
  0x19   : > { %p1890_p6 = pnand %p1889_p5, %p1888_p3  ;;  %p1894_p10 = scmp.lt.u32.totalorder %s1892_s21, %s1887_s11 }
  0x1a   : > { %p1896_p12 = scmp.lt.u32.totalorder %s1887_s11, %s2095_s6 }
  0x1b   : > { %p1891_p7 = pneg %p1890_p6  ;;  %p1895_p13 = por %p1894_p10, %p1893_p4 }
  0x1d   : > { %p1897_p1 = por %p1896_p12, %p1895_p13 }
  0x1f   : > { %p1898_p2 = pnand %p1897_p1, %p1891_p7 }
  0x21   : > { %1901 = shalt.err (!%p1898_p2)
}
  0x22   : > { %s1902_s28 = scalar_lea.vmem %s2097_s8, 128  ;;  %s2001_s29 = smov [#allocation2]  }
  0x23   : > { %p1903_p3 = scmp.ne.s32.totalorder %s2097_s8, %s1902_s28  ;;  %s1907_s30 = sshll.u32 %s2001_s29, 4  ;;  %s1908_s30 = int_to_ptr.vmem [resolvable:$false] %s1907_s30 }
  0x24   : > { %s1909_s4 = scalar_lea.vmem %s1908_s30, 256  ;;  %p1910_p9 = scmp.lt.s32.totalorder %s2097_s8, %s1908_s30 }
  0x25   : > { %p1905_p6 = pnand %p1903_p3, %p1889_p5  ;;  %p1911_p4 = scmp.lt.s32.totalorder %s1909_s4, %s1902_s28 }
  0x27   : > { %p1906_p11 = pneg %p1905_p6  ;;  %p1912_p10 = por %p1911_p4, %p1910_p9 }
  0x29   : > { %p1913_p12 = pnand %p1912_p10, %p1906_p11 }
  0x2b   : > { %1916 = shalt.err (!%p1913_p12)
}
  0x2c   : > { %1745 = dma.hbm_to_vmem [thread:$0]  (!%p2101_p0), %s2095_s6, 128, %s2097_s8, %s186_s10  }
  0x2d   : > { %p3306_p1 = scmp.lt.s32.totalorder %s1999_s17, 3  ;;  %p3307_p2 = scmp.ge.s32.totalorder %s1999_s17, 1 }
  0x2f   : > { %p203_p5 = pnand %p3307_p2, %p3306_p1 }
  0x31   : > { %206 = sbr.rel (%p203_p5) target bundleno = 854 (0x356), region = 32 }
  0x38   : > { %s2137_s5 = sand.u32 1, %s1983_s13  }
  0x39   : > { %s1650_s7 = sshll.u32 %s2137_s5, 3  ;;  %s209_s11 = scalar_lea.sflag [#allocation3], %s2137_s5 }
  0x3a   : > { %s2141_s18 = scalar_lea.vmem [#allocation2], %s1650_s7 }
  0x3b   : > { %1970 = dma.done.wait (%p2073_p8), %s209_s11, 128  }
  0x3c   : > { %1972 = vsyncadd (%p2073_p8), %s209_s11, 4294967168  ;;  %p253_p9 = scmp.lt.s32.totalorder %s1991_s15, 1  ;;  %v2002_v16 = vmov 0   ;;  %v484_v17 = vlaneseq  ;;  %s3159_s23 = scalar_lea.vmem [#allocation5], %s2137_s5 }
  0x3d   : > { %1804 = vset.pattern.permute.xlu1 %v2002_v16  ;;  %1803 = vset.pattern.permute.xlu0 %v2002_v16  ;;  %s1520_s24 = scalar_lea.sflag [#allocation4], %s2137_s5  ;;  %p3426_p11 = scmp.ne.s32.totalorder %s3303_s25, 0 }
  0x3e   : > { %s2149_s6 = scalar_select %p253_p9, %s1991_s15, 1  ;;  %v2205_v18 = vand.u32 127, %v484_v17 }
  0x40   : > { %s1722_s8 = sshll.u32 %s2149_s6, 7  ;;  %3308 = vst [vmem:[#allocation8_spill] sm:$0xff] %v2205_v18  ;;  %s1719_s6 = sshll.u32 %s1991_s15, 4 }
  0x41   : > { %s260_s19 = scalar_lea.vmem %s3226_s0, %s1722_s8  ;;  %s2388_s22 = scalar_lea.vmem %s3227_s1, %s1722_s8 }
  0x42   : > { %v2157_v0 = vld [vmem:[%s260_s19] sm:$0xff]  ;;  %v2159_v1 = vld [vmem:[%s260_s19 + $0x10] sm:$0xff]  ;;  %v2163_v2 = vld [vmem:[%s260_s19 + $0x8] sm:$0xff]  ;;  %s1532_s8 = sshll.u32 %s3159_s23, 4  ;;  %s2005_s15 = smov [#allocation5]   ;;  %s3178_s8 = int_to_ptr.vmem [resolvable:$true] %s1532_s8 }
  0x43   : > { %582 = vmax.xlane.f32.xlu0 %v2157_v0  ;;  %586 = vmax.xlane.f32.xlu1 %v2159_v1  ;;  %v2165_v3 = vld [vmem:[%s260_s19 + $0x18] sm:$0xff]  ;;  %v2169_v4 = vld [vmem:[%s260_s19 + $0x20] sm:$0xff]  ;;  %v2171_v5 = vld [vmem:[%s260_s19 + $0x28] sm:$0xff]  ;;  %s1917_s21 = scalar_lea.vmem %s3178_s8, 16 }
  0x44   : > { %v2175_v6 = vld [vmem:[%s260_s19 + $0x30] sm:$0xff]  ;;  %v2177_v7 = vld [vmem:[%s260_s19 + $0x38] sm:$0xff]  ;;  %v2181_v8 = vld [vmem:[%s260_s19 + $0x40] sm:$0xff]  ;;  %p1918_p8 = scmp.ne.s32.totalorder %s3178_s8, %s1917_s21 }
  0x45   : > { %v2183_v9 = vld [vmem:[%s260_s19 + $0x48] sm:$0xff]  ;;  %v2187_v10 = vld [vmem:[%s260_s19 + $0x50] sm:$0xff]  ;;  %v2189_v11 = vld [vmem:[%s260_s19 + $0x58] sm:$0xff] }
  0x46   : > { %v2193_v12 = vld [vmem:[%s260_s19 + $0x60] sm:$0xff]  ;;  %v2195_v13 = vld [vmem:[%s260_s19 + $0x68] sm:$0xff]  ;;  %v2199_v14 = vld [vmem:[%s260_s19 + $0x70] sm:$0xff]  ;;  %p1919_p0 = pnand %p1918_p8, %p3426_p11 }
  0x47   : > { %584 = vmax.xlane.f32.xlu0 %v2163_v2  ;;  %588 = vmax.xlane.f32.xlu1 %v2165_v3  ;;  %v2201_v15 = vld [vmem:[%s260_s19 + $0x78] sm:$0xff]  ;;  %s3176_s19 = scalar_lea.hbm %s3229_s3, %s1719_s6 }
  0x48   : > { %p1920_p7 = pneg %p1919_p0 }
  0x4b   : > { %590 = vmax.xlane.f32.xlu0 %v2169_v4  ;;  %592 = vmax.xlane.f32.xlu1 %v2171_v5 }
  0x4f   : > { %594 = vmax.xlane.f32.xlu0 %v2175_v6  ;;  %596 = vmax.xlane.f32.xlu1 %v2177_v7 }
  0x53   : > { %598 = vmax.xlane.f32.xlu0 %v2181_v8  ;;  %600 = vmax.xlane.f32.xlu1 %v2183_v9 }
  0x57   : > { %602 = vmax.xlane.f32.xlu0 %v2187_v10  ;;  %604 = vmax.xlane.f32.xlu1 %v2189_v11 }
  0x5b   : > { %606 = vmax.xlane.f32.xlu0 %v2193_v12  ;;  %608 = vmax.xlane.f32.xlu1 %v2195_v13 }
  0x5f   : > { %610 = vmax.xlane.f32.xlu0 %v2199_v14  ;;  %612 = vmax.xlane.f32.xlu1 %v2201_v15 }
  0xd0   : > { %v2207_v19 = vpop.xlane.xlu0 %582  ;;  %v2209_v20 = vpop.xlane.xlu1 %586 }
  0xd1   : > { %3309 = vst [vmem:[#allocation9_spill] sm:$0xff] %v2207_v19  ;;  %3310 = vst [vmem:[#allocation10_spill] sm:$0xff] %v2209_v20  ;;  %vm905_vm0 = vcmp.eq.f32.partialorder %v2159_v1, %v2209_v20  ;;  %vm903_vm1 = vcmp.eq.f32.partialorder %v2157_v0, %v2207_v19 }
  0xd2   : > { %v2216_v21 = vsel %vm903_vm1, %v2205_v18, 129  ;;  %v2219_v22 = vsel %vm905_vm0, %v2205_v18, 129 }
  0xd3   : > { %v936_v23 = vshra.s32 %v2216_v21, 16  ;;  %v964_v24 = vshra.s32 %v2219_v22, 16 }
  0xd4   : > { %v2223_v25 = vpop.xlane.xlu0 %584  ;;  %v2225_v26 = vpop.xlane.xlu1 %588 }
  0xd5   : > { %3311 = vst [vmem:[#allocation11_spill] sm:$0xff] %v2223_v25  ;;  %3312 = vst [vmem:[#allocation12_spill] sm:$0xff] %v2225_v26  ;;  %v2227_v27 = vcvt.s32.f32 %v936_v23  ;;  %vm906_vm2 = vcmp.eq.f32.partialorder %v2165_v3, %v2225_v26  ;;  %vm904_vm3 = vcmp.eq.f32.partialorder %v2163_v2, %v2223_v25  ;;  %v2234_v28 = vcvt.s32.f32 %v964_v24 }
  0xd6   : > { %v2237_v29 = vsel %vm904_vm3, %v2205_v18, 129  ;;  %v2240_v30 = vsel %vm906_vm2, %v2205_v18, 129 }
  0xd7   : > { %939 = vmin.xlane.f32.xlu0 %v2227_v27  ;;  %v950_v32 = vshra.s32 %v2237_v29, 16  ;;  %v978_v34 = vshra.s32 %v2240_v30, 16 }
  0xd8   : > { %v2242_v31 = vpop.xlane.xlu0 %590  ;;  %v2245_v33 = vpop.xlane.xlu1 %592 }
  0xd9   : > { %3313 = vst [vmem:[#allocation13_spill] sm:$0xff] %v2242_v31  ;;  %3314 = vst [vmem:[#allocation14_spill] sm:$0xff] %v2245_v33  ;;  %vm908_vm4 = vcmp.eq.f32.partialorder %v2171_v5, %v2245_v33  ;;  %v2250_v35 = vcvt.s32.f32 %v950_v32  ;;  %vm907_vm5 = vcmp.eq.f32.partialorder %v2169_v4, %v2242_v31  ;;  %v2264_v39 = vcvt.s32.f32 %v978_v34 }
  0xda   : > { %v2256_v36 = vsel %vm907_vm5, %v2205_v18, 129  ;;  %v2259_v37 = vsel %vm908_vm4, %v2205_v18, 129 }
  0xdb   : > { %967 = vmin.xlane.f32.xlu0 %v2234_v28  ;;  %953 = vmin.xlane.f32.xlu1 %v2250_v35  ;;  %v992_v40 = vshra.s32 %v2256_v36, 16  ;;  %v1006_v42 = vshra.s32 %v2259_v37, 16 }
  0xdc   : > { %v2262_v38 = vpop.xlane.xlu0 %594  ;;  %v2267_v41 = vpop.xlane.xlu1 %596 }
  0xdd   : > { %3315 = vst [vmem:[#allocation15_spill] sm:$0xff] %v2262_v38  ;;  %3316 = vst [vmem:[#allocation16_spill] sm:$0xff] %v2267_v41  ;;  %vm910_vm6 = vcmp.eq.f32.partialorder %v2177_v7, %v2267_v41  ;;  %v2272_v43 = vcvt.s32.f32 %v992_v40  ;;  %vm909_vm7 = vcmp.eq.f32.partialorder %v2175_v6, %v2262_v38  ;;  %v2286_v47 = vcvt.s32.f32 %v1006_v42 }
  0xde   : > { %v2277_v44 = vsel %vm909_vm7, %v2205_v18, 129  ;;  %v2280_v45 = vsel %vm910_vm6, %v2205_v18, 129 }
  0xdf   : > { %3317 = vst [vmem:[#allocation17_spill] sm:$0xff] %v2277_v44  ;;  %3318 = vst [vmem:[#allocation18_spill] sm:$0xff] %v2280_v45  ;;  %981 = vmin.xlane.f32.xlu1 %v2264_v39  ;;  %995 = vmin.xlane.f32.xlu0 %v2272_v43  ;;  %v1020_v48 = vshra.s32 %v2277_v44, 16  ;;  %v1034_v50 = vshra.s32 %v2280_v45, 16  ;;  %v2442_v45 = vld [vmem:[%s2388_s22 + $0x60] sm:$0xff] }
  0xe0   : > { %v2284_v46 = vpop.xlane.xlu0 %598  ;;  %v2289_v49 = vpop.xlane.xlu1 %600  ;;  %3347 = vst [vmem:[#allocation47_spill] sm:$0xff] %v2442_v45 }
  0xe1   : > { %3319 = vst [vmem:[#allocation19_spill] sm:$0xff] %v2284_v46  ;;  %3320 = vst [vmem:[#allocation20_spill] sm:$0xff] %v2289_v49  ;;  %vm912_vm8 = vcmp.eq.f32.partialorder %v2183_v9, %v2289_v49  ;;  %v2294_v51 = vcvt.s32.f32 %v1020_v48  ;;  %vm911_vm9 = vcmp.eq.f32.partialorder %v2181_v8, %v2284_v46  ;;  %v2308_v55 = vcvt.s32.f32 %v1034_v50 }
  0xe2   : > { %v2299_v52 = vsel %vm911_vm9, %v2205_v18, 129  ;;  %v2302_v53 = vsel %vm912_vm8, %v2205_v18, 129 }
  0xe3   : > { %3321 = vst [vmem:[#allocation21_spill] sm:$0xff] %v2294_v51  ;;  %3322 = vst [vmem:[#allocation22_spill] sm:$0xff] %v2299_v52  ;;  %1009 = vmin.xlane.f32.xlu1 %v2286_v47  ;;  %1023 = vmin.xlane.f32.xlu0 %v2294_v51  ;;  %v1048_v56 = vshra.s32 %v2299_v52, 16  ;;  %v1062_v58 = vshra.s32 %v2302_v53, 16  ;;  %v2407_v52 = vld [vmem:[%s2388_s22 + $0x28] sm:$0xff] }
  0xe4   : > { %3323 = vst [vmem:[#allocation23_spill] sm:$0xff] %v2302_v53  ;;  %v2306_v54 = vpop.xlane.xlu0 %602  ;;  %3325 = vst [vmem:[#allocation25_spill] sm:$0xff] %v2308_v55  ;;  %v2311_v57 = vpop.xlane.xlu1 %604 }
  0xe5   : > { %3324 = vst [vmem:[#allocation24_spill] sm:$0xff] %v2306_v54  ;;  %3326 = vst [vmem:[#allocation26_spill] sm:$0xff] %v2311_v57  ;;  %vm913_vm10 = vcmp.eq.f32.partialorder %v2187_v10, %v2306_v54  ;;  %v2316_v59 = vcvt.s32.f32 %v1048_v56  ;;  %vm914_vm11 = vcmp.eq.f32.partialorder %v2189_v11, %v2311_v57  ;;  %v2330_v63 = vcvt.s32.f32 %v1062_v58 }
  0xe6   : > { %v2321_v60 = vsel %vm913_vm10, %v2205_v18, 129  ;;  %v2324_v61 = vsel %vm914_vm11, %v2205_v18, 129  ;;  %3338 = vst [vmem:[#allocation38_spill] sm:$0xff] %v2407_v52 }
  0xe7   : > { %3327 = vst [vmem:[#allocation27_spill] sm:$0xff] %v2316_v59  ;;  %3328 = vst [vmem:[#allocation28_spill] sm:$0xff] %v2321_v60  ;;  %1037 = vmin.xlane.f32.xlu1 %v2308_v55  ;;  %1051 = vmin.xlane.f32.xlu0 %v2316_v59  ;;  %v1076_v16 = vshra.s32 %v2321_v60, 16  ;;  %v1090_v23 = vshra.s32 %v2324_v61, 16  ;;  %v2402_v59 = vld [vmem:[%s2388_s22 + $0x10] sm:$0xff]  ;;  %v2410_v55 = vld [vmem:[%s2388_s22 + $0x20] sm:$0xff] }
  0xe8   : > { %v2328_v62 = vpop.xlane.xlu0 %606  ;;  %3329 = vst [vmem:[#allocation29_spill] sm:$0xff] %v2330_v63  ;;  %v2333_v17 = vpop.xlane.xlu1 %608  ;;  %3337 = vst [vmem:[#allocation37_spill] sm:$0xff] %v2402_v59 }
  0xe9   : > { %3330 = vst [vmem:[#allocation30_spill] sm:$0xff] %v2333_v17  ;;  %vm915_vm12 = vcmp.eq.f32.partialorder %v2193_v12, %v2328_v62  ;;  %v2338_v24 = vcvt.s32.f32 %v1076_v16  ;;  %vm916_vm13 = vcmp.eq.f32.partialorder %v2195_v13, %v2333_v17  ;;  %v2352_v42 = vcvt.s32.f32 %v1090_v23  ;;  %3339 = vst [vmem:[#allocation39_spill] sm:$0xff] %v2410_v55 }
  0xea   : > { %v2343_v32 = vsel %vm915_vm12, %v2205_v18, 129  ;;  %v2346_v34 = vsel %vm916_vm13, %v2205_v18, 129 }
  0xeb   : > { %3331 = vst [vmem:[#allocation31_spill] sm:$0xff] %v2338_v24  ;;  %1065 = vmin.xlane.f32.xlu1 %v2330_v63  ;;  %1079 = vmin.xlane.f32.xlu0 %v2338_v24  ;;  %v1104_v48 = vshra.s32 %v2343_v32, 16  ;;  %v1118_v56 = vshra.s32 %v2346_v34, 16 }
  0xec   : > { %v2350_v40 = vpop.xlane.xlu0 %610  ;;  %v2355_v50 = vpop.xlane.xlu1 %612 }
  0xed   : > { %3332 = vst [vmem:[#allocation32_spill] sm:$0xff] %v2350_v40  ;;  %3333 = vst [vmem:[#allocation33_spill] sm:$0xff] %v2355_v50  ;;  %vm917_vm14 = vcmp.eq.f32.partialorder %v2199_v14, %v2350_v40  ;;  %v2360_v58 = vcvt.s32.f32 %v1104_v48  ;;  %vm918_vm15 = vcmp.eq.f32.partialorder %v2201_v15, %v2355_v50  ;;  %v2372_v24 = vcvt.s32.f32 %v1118_v56  ;;  %v2394_v56 = vld [vmem:[%s2388_s22 + $0x8] sm:$0xff] }
  0xee   : > { %v2365_v16 = vsel %vm917_vm14, %v2205_v18, 129  ;;  %v2368_v23 = vsel %vm918_vm15, %v2205_v18, 129  ;;  %3335 = vst [vmem:[#allocation35_spill] sm:$0xff] %v2394_v56 }
  0xef   : > { %1093 = vmin.xlane.f32.xlu1 %v2352_v42  ;;  %1107 = vmin.xlane.f32.xlu0 %v2360_v58  ;;  %v1132_v60 = vshra.s32 %v2365_v16, 16  ;;  %v1146_v48 = vshra.s32 %v2368_v23, 16 }
  0xf1   : > { %v2376_v63 = vcvt.s32.f32 %v1132_v60  ;;  %v2380_v53 = vcvt.s32.f32 %v1146_v48  ;;  %v2391_v60 = vld [vmem:[%s2388_s22] sm:$0xff]  ;;  %v2399_v48 = vld [vmem:[%s2388_s22 + $0x18] sm:$0xff] }
  0xf2   : > { %3334 = vst [vmem:[#allocation34_spill] sm:$0xff] %v2391_v60  ;;  %3336 = vst [vmem:[#allocation36_spill] sm:$0xff] %v2399_v48 }
  0xf3   : > { %1121 = vmin.xlane.f32.xlu1 %v2372_v24  ;;  %1135 = vmin.xlane.f32.xlu0 %v2376_v63 }
  0xf7   : > { %1149 = vmin.xlane.f32.xlu1 %v2380_v53 }
 0x108   : > { %487 = vperm.xlu1 %1804, %v2391_v60   ;;  %v2415_v60 = vld [vmem:[%s2388_s22 + $0x38] sm:$0xff] }
 0x109   : > { %490 = vperm.xlu0 %1803, %v2394_v56   ;;  %3340 = vst [vmem:[#allocation40_spill] sm:$0xff] %v2415_v60  ;;  %v2418_v56 = vld [vmem:[%s2388_s22 + $0x30] sm:$0xff] }
 0x10a   : > { %3341 = vst [vmem:[#allocation41_spill] sm:$0xff] %v2418_v56 }
 0x10c   : > { %496 = vperm.xlu1 %1804, %v2399_v48   ;;  %v2423_v48 = vld [vmem:[%s2388_s22 + $0x48] sm:$0xff] }
 0x10d   : > { %493 = vperm.xlu0 %1803, %v2402_v59   ;;  %3342 = vst [vmem:[#allocation42_spill] sm:$0xff] %v2423_v48  ;;  %v2426_v59 = vld [vmem:[%s2388_s22 + $0x40] sm:$0xff] }
 0x10e   : > { %3343 = vst [vmem:[#allocation43_spill] sm:$0xff] %v2426_v59 }
 0x110   : > { %502 = vperm.xlu1 %1804, %v2407_v52   ;;  %v2431_v52 = vld [vmem:[%s2388_s22 + $0x58] sm:$0xff] }
 0x111   : > { %499 = vperm.xlu0 %1803, %v2410_v55   ;;  %3344 = vst [vmem:[#allocation44_spill] sm:$0xff] %v2431_v52  ;;  %v2434_v55 = vld [vmem:[%s2388_s22 + $0x50] sm:$0xff] }
 0x112   : > { %3345 = vst [vmem:[#allocation45_spill] sm:$0xff] %v2434_v55 }
 0x114   : > { %508 = vperm.xlu1 %1804, %v2415_v60   ;;  %v2439_v60 = vld [vmem:[%s2388_s22 + $0x70] sm:$0xff] }
 0x115   : > { %505 = vperm.xlu0 %1803, %v2418_v56   ;;  %3346 = vst [vmem:[#allocation46_spill] sm:$0xff] %v2439_v60  ;;  %v2447_v56 = vld [vmem:[%s2388_s22 + $0x68] sm:$0xff] }
 0x116   : > { %3348 = vst [vmem:[#allocation48_spill] sm:$0xff] %v2447_v56 }
 0x118   : > { %514 = vperm.xlu1 %1804, %v2423_v48   ;;  %v2451_v48 = vld [vmem:[%s2388_s22 + $0x78] sm:$0xff] }
 0x119   : > { %511 = vperm.xlu0 %1803, %v2426_v59   ;;  %3349 = vst [vmem:[#allocation49_spill] sm:$0xff] %v2451_v48 }
 0x11c   : > { %520 = vperm.xlu1 %1804, %v2431_v52   ;;  %v615_v52 = vsub.f32 %v2163_v2, %v2223_v25 }
 0x11d   : > { %517 = vperm.xlu0 %1803, %v2434_v55   ;;  %v614_v55 = vsub.f32 %v2157_v0, %v2207_v19 }
 0x11e   : > { %v632_v59 = vmul.f32 1.442695, %v615_v52  ;;  %v618_v52 = vsub.f32 %v2169_v4, %v2242_v31 }
 0x11f   : > { %v630_v51 = vmul.f32 1.442695, %v614_v55 }
 0x120   : > { %529 = vperm.xlu1 %1804, %v2439_v60   ;;  %v620_v60 = vsub.f32 %v2175_v6, %v2262_v38  ;;  %1805 = vpow2.f32 %v632_v59  ;;  %v638_v55 = vmul.f32 1.442695, %v618_v52  ;;  %v622_v52 = vsub.f32 %v2181_v8, %v2284_v46 }
 0x121   : > { %523 = vperm.xlu0 %1803, %v2442_v45   ;;  %v616_v45 = vsub.f32 %v2159_v1, %v2209_v20  ;;  %1807 = vpow2.f32 %v630_v51  ;;  %v619_v20 = vsub.f32 %v2171_v5, %v2245_v33  ;;  %v1131_v33 = vand.u32 65535, %v2365_v16 }
 0x122   : > { %v1145_v16 = vand.u32 65535, %v2368_v23 }
 0x123   : > { %v634_v44 = vmul.f32 1.442695, %v616_v45  ;;  %v640_v45 = vmul.f32 1.442695, %v619_v20  ;;  %v935_v20 = vand.u32 65535, %v2216_v21 }
 0x125   : > { %526 = vperm.xlu0 %1803, %v2447_v56   ;;  %v642_v56 = vmul.f32 1.442695, %v620_v60 }
 0x127   : > { %1809 = vpow2.f32 %v642_v56 }
 0x128   : > { %1811 = vpow2.f32 %v634_v44  ;;  %v621_v44 = vsub.f32 %v2177_v7, %v2267_v41  ;;  %v1117_v41 = vand.u32 65535, %v2346_v34 }
 0x129   : > { %532 = vperm.xlu0 %1803, %v2451_v48   ;;  %v617_v48 = vsub.f32 %v2165_v3, %v2225_v26 }
 0x12a   : > { %v1806_v19 = vpop.eup %1805  ;;  %v644_v56 = vmul.f32 1.442695, %v621_v44  ;;  %v949_v44 = vand.u32 65535, %v2237_v29  ;;  %v1119_v34 = vcvt.s32.f32 %v1117_v41 }
 0x12b   : > { %v636_v25 = vmul.f32 1.442695, %v617_v48  ;;  %v1808_v59 = vpop.eup %1807 }
 0x12d   : > { %1813 = vpow2.f32 %v636_v25 }
 0x12e   : > { %1815 = vpow2.f32 %v638_v55  ;;  %v646_v55 = vmul.f32 1.442695, %v622_v52 }
 0x12f   : > { %1817 = vpow2.f32 %v640_v45  ;;  %v937_v45 = vcvt.s32.f32 %v935_v20 }
 0x130   : > { %1819 = vpow2.f32 %v644_v56 }
 0x131   : > { %v1810_v60 = vpop.eup %1809  ;;  %1821 = vpow2.f32 %v646_v55 }
 0x132   : > { %v1812_v51 = vpop.eup %1811 }
 0x137   : > { %v1814_v48 = vpop.eup %1813 }
 0x144   : > { %664 = vadd.xlane.f32.xlu1 %v1806_v19  ;;  %v1816_v19 = vpop.eup %1815 }
 0x145   : > { %v1818_v25 = vpop.eup %1817 }
 0x148   : > { %674 = vadd.xlane.f32.xlu1 %v1810_v60  ;;  %662 = vadd.xlane.f32.xlu0 %v1808_v59  ;;  %v1820_v59 = vpop.eup %1819 }
 0x14c   : > { %666 = vadd.xlane.f32.xlu0 %v1812_v51 }
 0x150   : > { %668 = vadd.xlane.f32.xlu0 %v1814_v48 }
 0x154   : > { %670 = vadd.xlane.f32.xlu0 %v1816_v19  ;;  %v951_v19 = vcvt.s32.f32 %v949_v44 }
 0x158   : > { %672 = vadd.xlane.f32.xlu0 %v1818_v25  ;;  %v1822_v25 = vpop.eup %1821 }
 0x15c   : > { %676 = vadd.xlane.f32.xlu0 %v1820_v59 }
 0x164   : > { %v2473_v60 = vpop.xlane.xlu0 %939 }
 0x165   : > { %vm941_vm0 = vcmp.eq.f32.partialorder %v2227_v27, %v2473_v60 }
 0x166   : > { %v942_v51 = vsel %vm941_vm0, %v937_v45, inf }
 0x167   : > { %943 = vmin.xlane.f32.xlu1 %v942_v51  ;;  %v1103_v51 = vand.u32 65535, %v2343_v32 }
 0x168   : > { %v2478_v56 = vpop.xlane.xlu0 %967  ;;  %v2480_v48 = vpop.xlane.xlu1 %953 }
 0x169   : > { %vm955_vm1 = vcmp.eq.f32.partialorder %v2250_v35, %v2480_v48  ;;  %v1089_v35 = vand.u32 65535, %v2324_v61  ;;  %v1105_v46 = vcvt.s32.f32 %v1103_v51  ;;  %v623_v61 = vsub.f32 %v2183_v9, %v2289_v49 }
 0x16a   : > { %v956_v21 = vsel %vm955_vm1, %v951_v19, inf  ;;  %v1133_v51 = vcvt.s32.f32 %v1131_v33  ;;  %v1147_v49 = vcvt.s32.f32 %v1145_v16  ;;  %v624_v33 = vsub.f32 %v2187_v10, %v2306_v54 }
 0x16b   : > { %678 = vadd.xlane.f32.xlu1 %v1822_v25  ;;  %957 = vmin.xlane.f32.xlu0 %v956_v21  ;;  %v1091_v21 = vcvt.s32.f32 %v1089_v35  ;;  %vm969_vm10 = vcmp.eq.f32.partialorder %v2234_v28, %v2478_v56 }
 0x16c   : > { %v2484_v52 = vpop.xlane.xlu1 %981  ;;  %v2486_v59 = vpop.xlane.xlu0 %995 }
 0x16d   : > { %vm983_vm12 = vcmp.eq.f32.partialorder %v2264_v39, %v2484_v52  ;;  %vm997_vm14 = vcmp.eq.f32.partialorder %v2272_v43, %v2486_v59 }
 0x170   : > { %v2488_v27 = vpop.xlane.xlu1 %1009  ;;  %v2490_v29 = vpop.xlane.xlu0 %1023 }
 0x171   : > { %vm1011_vm0 = vcmp.eq.f32.partialorder %v2286_v47, %v2488_v27 }
 0x174   : > { %v2492_v55 = vpop.xlane.xlu1 %1037  ;;  %v2494_v20 = vpop.xlane.xlu0 %1051 }
 0x178   : > { %v2496_v45 = vpop.xlane.xlu1 %1065  ;;  %v2498_v44 = vpop.xlane.xlu0 %1079 }
 0x17c   : > { %v2502_v19 = vpop.xlane.xlu1 %1093  ;;  %v2504_v25 = vpop.xlane.xlu0 %1107 }
 0x17d   : > { %vm1095_vm2 = vcmp.eq.f32.partialorder %v2352_v42, %v2502_v19  ;;  %vm1109_vm3 = vcmp.eq.f32.partialorder %v2360_v58, %v2504_v25  ;;  %v648_v42 = vmul.f32 1.442695, %v623_v61  ;;  %v650_v61 = vmul.f32 1.442695, %v624_v33 }
 0x17e   : > { %v2514_v32 = vsel %vm1095_vm2, %v1091_v21, inf  ;;  %v2516_v31 = vsel %vm1109_vm3, %v1105_v46, inf }
 0x17f   : > { %1823 = vpow2.f32 %v648_v42 }
 0x180   : > { %v2518_v26 = vpop.xlane.xlu1 %1121  ;;  %v2520_v35 = vpop.xlane.xlu0 %1135  ;;  %1825 = vpow2.f32 %v650_v61 }
 0x181   : > { %vm1123_vm4 = vcmp.eq.f32.partialorder %v2372_v24, %v2518_v26  ;;  %vm1137_vm5 = vcmp.eq.f32.partialorder %v2376_v63, %v2520_v35  ;;  %v963_v63 = vand.u32 65535, %v2219_v22 }
 0x182   : > { %v2527_v58 = vsel %vm1123_vm4, %v1119_v34, inf  ;;  %v2529_v21 = vsel %vm1137_vm5, %v1133_v51, inf  ;;  %v625_v34 = vsub.f32 %v2189_v11, %v2311_v57  ;;  %v3284_v51 = vmov 0.0  }
 0x184   : > { %v2531_v46 = vpop.xlane.xlu1 %1149  ;;  %v652_v22 = vmul.f32 1.442695, %v625_v34  ;;  %v627_v34 = vsub.f32 %v2195_v13, %v2333_v17 }
 0x185   : > { %vm1151_vm6 = vcmp.eq.f32.partialorder %v2380_v53, %v2531_v46 }
 0x186   : > { %v2537_v41 = vsel %vm1151_vm6, %v1147_v49, inf  ;;  %1827 = vpow2.f32 %v652_v22 }
 0x188   : > { %v488_v24 = vpop.permute.xlu1 %487  ;;  %v491_v23 = vpop.permute.xlu0 %490 }
 0x189   : > { %vm534_vm7 = vcmp.eq.s32.totalorder %v2205_v18, %v488_v24  ;;  %vm535_vm8 = vcmp.eq.s32.totalorder %v2205_v18, %v491_v23  ;;  %v965_v24 = vcvt.s32.f32 %v963_v63  ;;  %v977_v23 = vand.u32 65535, %v2240_v30  ;;  %v1824_v57 = vpop.eup %1823 }
 0x18a   : > { %v1671_v53 = vsel %vm534_vm7, 1.0, %v3284_v51  ;;  %v1672_v16 = vsel %vm535_vm8, 1.0, %v3284_v51 }
 0x18b   : > { %v742_v49 = vmul.f32 %v1671_v53, %v2157_v0  ;;  %v743_v42 = vmul.f32 %v1672_v16, %v2163_v2  ;;  %v970_v0 = vsel %vm969_vm10, %v965_v24, inf  ;;  %v626_v2 = vsub.f32 %v2193_v12, %v2328_v62  ;;  %v1826_v16 = vpop.eup %1825 }
 0x18c   : > { %v494_v54 = vpop.permute.xlu0 %493  ;;  %v497_v33 = vpop.permute.xlu1 %496  ;;  %v979_v28 = vcvt.s32.f32 %v977_v23  ;;  %v991_v53 = vand.u32 65535, %v2256_v36 }
 0x18d   : > { %vm536_vm9 = vcmp.eq.s32.totalorder %v2205_v18, %v494_v54  ;;  %758 = vadd.xlane.f32.xlu0 %v742_v49  ;;  %760 = vadd.xlane.f32.xlu1 %v743_v42  ;;  %vm537_vm11 = vcmp.eq.s32.totalorder %v2205_v18, %v497_v33  ;;  %v654_v61 = vmul.f32 1.442695, %v626_v2  ;;  %v1005_v42 = vand.u32 65535, %v2259_v37 }
 0x18e   : > { %v1673_v38 = vsel %vm536_vm9, 1.0, %v3284_v51  ;;  %v1674_v30 = vsel %vm537_vm11, 1.0, %v3284_v51  ;;  %v984_v63 = vsel %vm983_vm12, %v979_v28, inf  ;;  %v993_v49 = vcvt.s32.f32 %v991_v53  ;;  %v3352_v53 = vld [vmem:[#allocation18_spill] sm:$0xff] }
 0x18f   : > { %v744_v54 = vmul.f32 %v1673_v38, %v2159_v1  ;;  %v745_v39 = vmul.f32 %v1674_v30, %v2165_v3  ;;  %1829 = vpow2.f32 %v654_v61  ;;  %v656_v1 = vmul.f32 1.442695, %v627_v34 }
 0x190   : > { %v503_v38 = vpop.permute.xlu1 %502  ;;  %v1828_v22 = vpop.eup %1827  ;;  %v998_v36 = vsel %vm997_vm14, %v993_v49, inf  ;;  %v628_v3 = vsub.f32 %v2199_v14, %v2350_v40  ;;  %v1007_v43 = vcvt.s32.f32 %v1005_v42  ;;  %v629_v2 = vsub.f32 %v2201_v15, %v2355_v50 }
 0x191   : > { %971 = vmin.xlane.f32.xlu0 %v970_v0  ;;  %680 = vadd.xlane.f32.xlu1 %v1824_v57  ;;  %v500_v57 = vpop.permute.xlu0 %499  ;;  %vm539_vm15 = vcmp.eq.s32.totalorder %v2205_v18, %v503_v38  ;;  %1831 = vpow2.f32 %v656_v1  ;;  %vm822_vm12 = vcmask 7168  }
 0x192   : > { %vm538_vm13 = vcmp.eq.s32.totalorder %v2205_v18, %v500_v57  ;;  %v1676_v37 = vsel %vm539_vm15, 1.0, %v3284_v51  ;;  %v1012_v23 = vsel %vm1011_vm0, %v1007_v43, inf  ;;  %v658_v0 = vmul.f32 1.442695, %v628_v3  ;;  %v3354_v3 = vld [vmem:[#allocation22_spill] sm:$0xff] }
 0x193   : > { %v1675_v33 = vsel %vm538_vm13, 1.0, %v3284_v51  ;;  %v747_v47 = vmul.f32 %v1676_v37, %v2171_v5  ;;  %v660_v61 = vmul.f32 1.442695, %v629_v2  ;;  %v3353_v5 = vld [vmem:[#allocation25_spill] sm:$0xff]  ;;  %v1047_v43 = vand.u32 65535, %v3354_v3  ;;  %v3355_v37 = vld [vmem:[#allocation35_spill] sm:$0xff] }
 0x194   : > { %v746_v24 = vmul.f32 %v1675_v33, %v2169_v4  ;;  %v3351_v4 = vld [vmem:[#allocation21_spill] sm:$0xff]  ;;  %1833 = vpow2.f32 %v658_v0  ;;  %v509_v34 = vpop.permute.xlu1 %508  ;;  %vm1039_vm4 = vcmp.eq.f32.partialorder %v3353_v5, %v2492_v55  ;;  %vm437_vm5 = vcmp.eq.s32.totalorder %v3355_v37, 4  ;;  %v3356_v0 = vld [vmem:[#allocation27_spill] sm:$0xff] }
 0x195   : > { %985 = vmin.xlane.f32.xlu1 %v984_v63  ;;  %762 = vadd.xlane.f32.xlu0 %v744_v54  ;;  %v506_v28 = vpop.permute.xlu0 %505  ;;  %v3350_v54 = vld [vmem:[#allocation17_spill] sm:$0xff]  ;;  %vm1025_vm2 = vcmp.eq.f32.partialorder %v3351_v4, %v2490_v29  ;;  %vm541_vm3 = vcmp.eq.s32.totalorder %v2205_v18, %v509_v34  ;;  %1835 = vpow2.f32 %v660_v61  ;;  %vm1053_vm7 = vcmp.eq.f32.partialorder %v3356_v0, %v2494_v20 }
 0x196   : > { %v1019_v30 = vand.u32 65535, %v3350_v54  ;;  %vm540_vm1 = vcmp.eq.s32.totalorder %v2205_v18, %v506_v28  ;;  %v1049_v2 = vcvt.s32.f32 %v1047_v43  ;;  %v3357_v28 = vld [vmem:[#allocation23_spill] sm:$0xff] }
 0x197   : > { %v1677_v1 = vsel %vm540_vm1, 1.0, %v3284_v51  ;;  %v1061_v54 = vand.u32 65535, %v3357_v28 }
 0x198   : > { %v1021_v57 = vcvt.s32.f32 %v1019_v30  ;;  %v748_v42 = vmul.f32 %v1677_v1, %v2175_v6  ;;  %v515_v6 = vpop.permute.xlu1 %514  ;;  %v2004_v30 = vmov 1.0   ;;  %v1054_v34 = vsel %vm1053_vm7, %v1049_v2, inf }
 0x199   : > { %764 = vadd.xlane.f32.xlu1 %v745_v39  ;;  %682 = vadd.xlane.f32.xlu0 %v1826_v16  ;;  %v1830_v63 = vpop.eup %1829  ;;  %v1033_v39 = vand.u32 65535, %v3352_v53  ;;  %vm543_vm10 = vcmp.eq.s32.totalorder %v2205_v18, %v515_v6  ;;  %v3361_v53 = vld [vmem:[#allocation28_spill] sm:$0xff] }
 0x19a   : > { %v1026_v38 = vsel %vm1025_vm2, %v1021_v57, inf  ;;  %v3360_v57 = vld [vmem:[#allocation29_spill] sm:$0xff]  ;;  %v1680_v3 = vsel %vm543_vm10, 1.0, %v3284_v51 }
 0x19b   : > { %v1832_v16 = vpop.eup %1831  ;;  %v1035_v49 = vcvt.s32.f32 %v1033_v39  ;;  %vm1067_vm11 = vcmp.eq.f32.partialorder %v3360_v57, %v2496_v45  ;;  %v1075_v39 = vand.u32 65535, %v3361_v53  ;;  %v751_v28 = vmul.f32 %v1680_v3, %v2183_v9 }
 0x19d   : > { %684 = vadd.xlane.f32.xlu1 %v1828_v22  ;;  %999 = vmin.xlane.f32.xlu0 %v998_v36  ;;  %v1678_v22 = vsel %vm541_vm3, 1.0, %v3284_v51  ;;  %v1040_v33 = vsel %vm1039_vm4, %v1035_v49, inf  ;;  %v512_v36 = vpop.permute.xlu0 %511  ;;  %v1077_v0 = vcvt.s32.f32 %v1075_v39 }
 0x19e   : > { %vm542_vm6 = vcmp.eq.s32.totalorder %v2205_v18, %v512_v36  ;;  %v3362_v36 = vld [vmem:[#allocation36_spill] sm:$0xff] }
 0x19f   : > { %v1679_v61 = vsel %vm542_vm6, 1.0, %v3284_v51  ;;  %vm439_vm13 = vcmp.eq.s32.totalorder %v3362_v36, 4 }
 0x1a0   : > { %v455_v2 = vsel %vm439_vm13, 0.1, %v2004_v30 }
 0x1a1   : > { %1013 = vmin.xlane.f32.xlu1 %v1012_v23  ;;  %766 = vadd.xlane.f32.xlu0 %v746_v24  ;;  %v749_v24 = vmul.f32 %v1678_v22, %v2177_v7  ;;  %v1834_v23 = vpop.eup %1833  ;;  %v3359_v7 = vld [vmem:[#allocation37_spill] sm:$0xff]  ;;  %v518_v1 = vpop.permute.xlu0 %517  ;;  %v2630_v57 = vmul.f32 0.0, %v455_v2 }
 0x1a2   : > { %vm438_vm9 = vcmp.eq.s32.totalorder %v3359_v7, 4  ;;  %v1836_v4 = vpop.eup %1835  ;;  %vm544_vm14 = vcmp.eq.s32.totalorder %v2205_v18, %v518_v1 }
 0x1a3   : > { %v454_v49 = vsel %vm438_vm9, 0.1, %v2004_v30  ;;  %v868_v1 = vsel %vm822_vm12, %v2630_v57, 0.0 }
 0x1a5   : > { %768 = vadd.xlane.f32.xlu1 %v747_v47  ;;  %686 = vadd.xlane.f32.xlu0 %v1830_v63  ;;  %v453_v47 = vsel %vm437_vm5, 0.1, %v2004_v30  ;;  %v3358_v63 = vld [vmem:[#allocation34_spill] sm:$0xff] }
 0x1a6   : > { %vm436_vm8 = vcmp.eq.s32.totalorder %v3358_v63, 4 }
 0x1a7   : > { %v2608_v5 = vsel %vm436_vm8, 0.1, %v2004_v30 }
 0x1a8   : > { %v863_v22 = vsel %vm822_vm12, %v2608_v5, 0.0 }
 0x1a9   : > { %688 = vadd.xlane.f32.xlu1 %v1832_v16  ;;  %1027 = vmin.xlane.f32.xlu0 %v1026_v38  ;;  %v2605_v16 = vmul.f32 0.0, %v453_v47  ;;  %v1063_v38 = vcvt.s32.f32 %v1061_v54  ;;  %v3364_v47 = vld [vmem:[#allocation39_spill] sm:$0xff] }
 0x1aa   : > { %vm440_vm0 = vcmp.eq.s32.totalorder %v3364_v47, 4 }
 0x1ab   : > { %v1068_v43 = vsel %vm1067_vm11, %v1063_v38, inf  ;;  %v456_v39 = vsel %vm440_vm0, 0.1, %v2004_v30  ;;  %v3365_v38 = vld [vmem:[#allocation38_spill] sm:$0xff] }
 0x1ac   : > { %vm441_vm2 = vcmp.eq.s32.totalorder %v3365_v38, 4 }
 0x1ad   : > { %1041 = vmin.xlane.f32.xlu1 %v1040_v33  ;;  %770 = vadd.xlane.f32.xlu0 %v748_v42  ;;  %v750_v42 = vmul.f32 %v1679_v61, %v2181_v8  ;;  %v864_v33 = vsel %vm822_vm12, %v2605_v16, 0.0  ;;  %v521_v8 = vpop.permute.xlu1 %520  ;;  %v524_v61 = vpop.permute.xlu0 %523  ;;  %v457_v3 = vsel %vm441_vm2, 0.1, %v2004_v30  ;;  %vm388_vm2 = vcmp.ne.s32.totalorder %v3358_v63, 4 }
 0x1ae   : > { %v865_v6 = vadd.f32 %v864_v33, %v863_v22  ;;  %vm545_vm1 = vcmp.eq.s32.totalorder %v2205_v18, %v521_v8  ;;  %vm546_vm3 = vcmp.eq.s32.totalorder %v2205_v18, %v524_v61  ;;  %v3366_v8 = vld [vmem:[#allocation41_spill] sm:$0xff] }
 0x1af   : > { %vm442_vm4 = vcmp.eq.s32.totalorder %v3366_v8, 4 }
 0x1b0   : > { %v458_v2 = vsel %vm442_vm4, 0.1, %v2004_v30  ;;  %vm390_vm4 = vcmp.ne.s32.totalorder %v3359_v7, 4 }
 0x1b1   : > { %772 = vadd.xlane.f32.xlu1 %v749_v24  ;;  %690 = vadd.xlane.f32.xlu0 %v1834_v23  ;;  %v3363_v24 = vld [vmem:[#allocation31_spill] sm:$0xff]  ;;  %v2621_v23 = vmul.f32 0.0, %v454_v49  ;;  %v1682_v49 = vsel %vm545_vm1, 1.0, %v3284_v51  ;;  %v527_v22 = vpop.permute.xlu0 %526 }
 0x1b2   : > { %vm1081_vm15 = vcmp.eq.f32.partialorder %v3363_v24, %v2498_v44  ;;  %v1683_v24 = vsel %vm546_vm3, 1.0, %v3284_v51  ;;  %vm547_vm5 = vcmp.eq.s32.totalorder %v2205_v18, %v527_v22  ;;  %vm389_vm3 = vcmp.ne.s32.totalorder %v3355_v37, 4 }
 0x1b3   : > { %v866_v54 = vsel %vm822_vm12, %v2621_v23, 0.0 }
 0x1b4   : > { %v867_v53 = vadd.f32 %v866_v54, %v865_v6  ;;  %v3367_v54 = vld [vmem:[#allocation40_spill] sm:$0xff] }
 0x1b5   : > { %692 = vadd.xlane.f32.xlu1 %v1836_v4  ;;  %1055 = vmin.xlane.f32.xlu0 %v1054_v34  ;;  %v1681_v4 = vsel %vm544_vm14, 1.0, %v3284_v51  ;;  %v1082_v34 = vsel %vm1081_vm15, %v1077_v0, inf  ;;  %v530_v0 = vpop.permute.xlu1 %529  ;;  %vm443_vm6 = vcmp.eq.s32.totalorder %v3367_v54, 4  ;;  %v533_v61 = vpop.permute.xlu0 %532 }
 0x1b6   : > { %v752_v9 = vmul.f32 %v1681_v4, %v2187_v10  ;;  %v869_v33 = vadd.f32 %v868_v1, %v867_v53  ;;  %v753_v10 = vmul.f32 %v1682_v49, %v2189_v11  ;;  %v754_v11 = vmul.f32 %v1683_v24, %v2193_v12  ;;  %v3369_v24 = vld [vmem:[#allocation42_spill] sm:$0xff] }
 0x1b7   : > { %v1684_v4 = vsel %vm547_vm5, 1.0, %v3284_v51  ;;  %vm548_vm7 = vcmp.eq.s32.totalorder %v2205_v18, %v530_v0  ;;  %v459_v53 = vsel %vm443_vm6, 0.1, %v2004_v30  ;;  %vm549_vm8 = vcmp.eq.s32.totalorder %v2205_v18, %v533_v61 }
 0x1b8   : > { %v755_v12 = vmul.f32 %v1684_v4, %v2195_v13  ;;  %v1686_v13 = vsel %vm549_vm8, 1.0, %v3284_v51  ;;  %vm445_vm10 = vcmp.eq.s32.totalorder %v3369_v24, 4  ;;  %vm391_vm6 = vcmp.ne.s32.totalorder %v3362_v36, 4 }
 0x1b9   : > { %1069 = vmin.xlane.f32.xlu1 %v1068_v43  ;;  %774 = vadd.xlane.f32.xlu0 %v750_v42  ;;  %v2640_v42 = vmul.f32 0.0, %v456_v39 }
 0x1bb   : > { %v870_v43 = vsel %vm822_vm12, %v2640_v42, 0.0 }
 0x1bc   : > { %v871_v6 = vadd.f32 %v870_v43, %v869_v33  ;;  %v3368_v33 = vld [vmem:[#allocation43_spill] sm:$0xff] }
 0x1bd   : > { %1083 = vmin.xlane.f32.xlu1 %v1082_v34  ;;  %776 = vadd.xlane.f32.xlu0 %v751_v28  ;;  %vm444_vm9 = vcmp.eq.s32.totalorder %v3368_v33, 4 }
 0x1c1   : > { %1097 = vmin.xlane.f32.xlu1 %v2514_v32  ;;  %778 = vadd.xlane.f32.xlu0 %v752_v9  ;;  %v2650_v32 = vmul.f32 0.0, %v457_v3  ;;  %v1685_v9 = vsel %vm548_vm7, 1.0, %v3284_v51 }
 0x1c2   : > { %v756_v49 = vmul.f32 %v1685_v9, %v2199_v14 }
 0x1c3   : > { %v872_v28 = vsel %vm822_vm12, %v2650_v32, 0.0 }
 0x1c4   : > { %v873_v34 = vadd.f32 %v872_v28, %v871_v6  ;;  %v3371_v28 = vld [vmem:[#allocation45_spill] sm:$0xff] }
 0x1c5   : > { %1111 = vmin.xlane.f32.xlu1 %v2516_v31  ;;  %780 = vadd.xlane.f32.xlu0 %v753_v10  ;;  %v2660_v31 = vmul.f32 0.0, %v458_v2  ;;  %v460_v10 = vsel %vm444_vm9, 0.1, %v2004_v30  ;;  %vm446_vm11 = vcmp.eq.s32.totalorder %v3371_v28, 4 }
 0x1c6   : > { %v2679_v43 = vmul.f32 0.0, %v460_v10  ;;  %v462_v4 = vsel %vm446_vm11, 0.1, %v2004_v30  ;;  %vm393_vm11 = vcmp.ne.s32.totalorder %v3365_v38, 4 }
 0x1c7   : > { %v874_v39 = vsel %vm822_vm12, %v2660_v31, 0.0  ;;  %v2693_v61 = vmul.f32 0.0, %v462_v4  ;;  %v3379_v4 = vld [vmem:[#allocation46_spill] sm:$0xff] }
 0x1c8   : > { %v875_v1 = vadd.f32 %v874_v39, %v873_v34  ;;  %v878_v14 = vsel %vm822_vm12, %v2679_v43, 0.0  ;;  %vm450_vm0 = vcmp.eq.s32.totalorder %v3379_v4, 4 }
 0x1c9   : > { %1125 = vmin.xlane.f32.xlu1 %v2527_v58  ;;  %782 = vadd.xlane.f32.xlu0 %v754_v11  ;;  %v2669_v58 = vmul.f32 0.0, %v459_v53  ;;  %3372 = vst [vmem:[#allocation21_spill] sm:$0xff] %v2693_v61  ;;  %v882_v53 = vsel %vm822_vm12, %v2693_v61, 0.0 }
 0x1cb   : > { %v876_v22 = vsel %vm822_vm12, %v2669_v58, 0.0 }
 0x1cc   : > { %v877_v3 = vadd.f32 %v876_v22, %v875_v1  ;;  %v3375_v22 = vld [vmem:[#allocation47_spill] sm:$0xff] }
 0x1cd   : > { %1139 = vmin.xlane.f32.xlu1 %v2529_v21  ;;  %784 = vadd.xlane.f32.xlu0 %v755_v12  ;;  %v757_v21 = vmul.f32 %v1686_v13, %v2201_v15  ;;  %v3373_v12 = vld [vmem:[#allocation44_spill] sm:$0xff]  ;;  %vm448_vm14 = vcmp.eq.s32.totalorder %v3375_v22, 4 }
 0x1ce   : > { %v879_v6 = vadd.f32 %v878_v14, %v877_v3  ;;  %vm447_vm13 = vcmp.eq.s32.totalorder %v3373_v12, 4  ;;  %v464_v10 = vsel %vm448_vm14, 0.1, %v2004_v30  ;;  %v3377_v14 = vld [vmem:[#allocation48_spill] sm:$0xff]  ;;  %vm395_vm14 = vcmp.ne.s32.totalorder %v3367_v54, 4 }
 0x1cf   : > { %v463_v9 = vsel %vm447_vm13, 0.1, %v2004_v30  ;;  %vm449_vm15 = vcmp.eq.s32.totalorder %v3377_v14, 4  ;;  %vm394_vm13 = vcmp.ne.s32.totalorder %v3366_v8, 4  ;;  %v988_v8 = vcvt.f32.s32 %v2484_v52 }
 0x1d0   : > { %v2701_v1 = vmul.f32 0.0, %v463_v9  ;;  %v466_v9 = vsel %vm450_vm0, 0.1, %v2004_v30  ;;  %vm397_vm0 = vcmp.ne.s32.totalorder %v3369_v24, 4  ;;  %v1142_v24 = vcvt.f32.s32 %v2520_v35 }
 0x1d1   : > { %1153 = vmin.xlane.f32.xlu1 %v2537_v41  ;;  %786 = vadd.xlane.f32.xlu0 %v756_v49  ;;  %v461_v41 = vsel %vm445_vm10, 0.1, %v2004_v30  ;;  %v2725_v18 = vmul.f32 0.0, %v466_v9  ;;  %vm392_vm10 = vcmp.ne.s32.totalorder %v3364_v47, 4 }
 0x1d2   : > { %v2687_v2 = vmul.f32 0.0, %v461_v41  ;;  %3374 = vst [vmem:[#allocation18_spill] sm:$0xff] %v2701_v1  ;;  %v884_v49 = vsel %vm822_vm12, %v2701_v1, 0.0 }
 0x1d3   : > { %3381 = vst [vmem:[#allocation35_spill] sm:$0xff] %v2725_v18 }
 0x1d4   : > { %3370 = vst [vmem:[#allocation17_spill] sm:$0xff] %v2687_v2  ;;  %v880_v11 = vsel %vm822_vm12, %v2687_v2, 0.0 }
 0x1d5   : > { %788 = vadd.xlane.f32.xlu0 %v757_v21  ;;  %v2684_v0 = vpop.xlane.xlu0 %662  ;;  %v881_v15 = vadd.f32 %v880_v11, %v879_v6  ;;  %v2709_v21 = vmul.f32 0.0, %v464_v10  ;;  %v465_v6 = vsel %vm449_vm15, 0.1, %v2004_v30  ;;  %vm396_vm15 = vcmp.ne.s32.totalorder %v3368_v33, 4 }
 0x1d6   : > { %v2715_v11 = vmul.f32 0.0, %v465_v6  ;;  %v2729_v6 = vpop.xlane.xlu1 %664  ;;  %v2819_v33 = vshll.u32 %v988_v8, 16 }
 0x1d7   : > { %v883_v39 = vadd.f32 %v882_v53, %v881_v15  ;;  %3376 = vst [vmem:[#allocation25_spill] sm:$0xff] %v2709_v21  ;;  %v886_v41 = vsel %vm822_vm12, %v2709_v21, 0.0  ;;  %v3380_v53 = vld [vmem:[#allocation49_spill] sm:$0xff]  ;;  %1837 = vlog2.f32 %v2729_v6 }
 0x1d8   : > { %3378 = vst [vmem:[#allocation22_spill] sm:$0xff] %v2715_v11  ;;  %vm451_vm1 = vcmp.eq.s32.totalorder %v3380_v53, 4 }
 0x1d9   : > { %v2695_v34 = vpop.xlane.xlu0 %666  ;;  %v885_v3 = vadd.f32 %v884_v49, %v883_v39  ;;  %v888_v39 = vsel %vm822_vm12, %v2715_v11, 0.0  ;;  %v467_v49 = vsel %vm451_vm1, 0.1, %v2004_v30  ;;  %vm398_vm1 = vcmp.ne.s32.totalorder %v3371_v28, 4 }
 0x1da   : > { %v2727_v50 = vmul.f32 0.0, %v467_v49  ;;  %v2737_v30 = vpop.xlane.xlu1 %674 }
 0x1db   : > { %v887_v15 = vadd.f32 %v886_v41, %v885_v3  ;;  %v890_v3 = vsel %vm822_vm12, %v2725_v18, 0.0  ;;  %1839 = vlog2.f32 %v2737_v30 }
 0x1dc   : > { %3382 = vst [vmem:[#allocation27_spill] sm:$0xff] %v2727_v50  ;;  %v892_v41 = vsel %vm822_vm12, %v2727_v50, 0.0  ;;  %v960_v50 = vcvt.f32.s32 %v2480_v48  ;;  %1841 = vlog2.f32 %v2684_v0 }
 0x1dd   : > { %v2706_v13 = vpop.xlane.xlu0 %668  ;;  %v889_v51 = vadd.f32 %v888_v39, %v887_v15  ;;  %v946_v15 = vcvt.f32.s32 %v2473_v60  ;;  %1843 = vlog2.f32 %v2695_v34 }
 0x1de   : > { %1845 = vlog2.f32 %v2706_v13  ;;  %v1044_v13 = vcvt.f32.s32 %v2492_v55 }
 0x1df   : > { %v891_v53 = vadd.f32 %v890_v3, %v889_v51  ;;  %v947_v9 = vshll.u32 %v946_v15, 16  ;;  %v3383_v51 = vmov 0.0   ;;  %v961_v15 = vshll.u32 %v960_v50, 16 }
 0x1e0   : > { %v1655_v3 = vsel %vm388_vm2, 1.0, %v3383_v51  ;;  %v2760_v50 = vsel %vm391_vm6, 1.0, %v3383_v51  ;;  %v2806_v54 = vsel %vm395_vm14, 1.0, %v3383_v51  ;;  %vm399_vm2 = vcmp.ne.s32.totalorder %v3373_v12, 4  ;;  %1515 = vst [vmem:[%s3159_s23] sm:$0x1] %v3383_v51 }
 0x1e1   : > { %v2723_v10 = vpop.xlane.xlu0 %670  ;;  %v893_v11 = vadd.f32 %v892_v41, %v891_v53  ;;  %v1656_v53 = vsel %vm389_vm3, 1.0, %v3383_v51  ;;  %v1367_v60 = vsel %vm822_vm12, %v1655_v3, 0.0  ;;  %vm400_vm3 = vcmp.ne.s32.totalorder %v3375_v22, 4  ;;  %v3395_v22 = vld [vmem:[#allocation10_spill] sm:$0xff] }
 0x1e2   : > { %1847 = vlog2.f32 %v2723_v10  ;;  %v2873_v35 = vsel %vm398_vm1, 1.0, %v3383_v51 }
 0x1e3   : > { %894 = vadd.xlane.f32.xlu0 %v893_v11  ;;  %v1368_v11 = vsel %vm822_vm12, %v1656_v53, 0.0 }
 0x1e5   : > { %v2735_v21 = vpop.xlane.xlu0 %672 }
 0x1e6   : > { %1849 = vlog2.f32 %v2735_v21 }
 0x1e9   : > { %v2742_v49 = vpop.xlane.xlu0 %676 }
 0x1ea   : > { %1851 = vlog2.f32 %v2742_v49 }
 0x1f4   : > { %v944_v39 = vpop.xlane.xlu1 %943 }
 0x1f5   : > { %v945_v18 = vcvt.f32.s32 %v944_v39  ;;  %v1369_v39 = vadd.f32 %v1368_v11, %v1367_v60 }
 0x1f7   : > { %v948_v41 = vadd.s32 %v947_v9, %v945_v18  ;;  %v2754_v18 = vsel %vm390_vm4, 1.0, %v3383_v51  ;;  %vm401_vm4 = vcmp.ne.s32.totalorder %v3377_v14, 4  ;;  %v3396_v14 = vld [vmem:[#allocation12_spill] sm:$0xff] }
 0x1f8   : > { %v958_v1 = vpop.xlane.xlu0 %957  ;;  %v1370_v7 = vsel %vm822_vm12, %v2754_v18, 0.0  ;;  %v2909_v12 = vsel %vm401_vm4, 1.0, %v3383_v51 }
 0x1f9   : > { %vm1159_vm5 = vcmp.eq.s32.totalorder %v948_v41, %v3358_v63  ;;  %v959_v40 = vcvt.f32.s32 %v958_v1  ;;  %vm1263_vm7 = vcmp.ne.s32.totalorder %v948_v41, 4  ;;  %v1371_v60 = vadd.f32 %v1370_v7, %v1369_v39 }
 0x1fa   : > { %v1687_v48 = vsel %vm1159_vm5, 1.0, %v3383_v51  ;;  %v1703_v63 = vsel %vm1263_vm7, 1.0, %v3383_v51  ;;  %vm402_vm5 = vcmp.ne.s32.totalorder %v3379_v4, 4 }
 0x1fb   : > { %v962_v9 = vadd.s32 %v961_v15, %v959_v40  ;;  %v1207_v61 = vmul.f32 %v1687_v48, %v1655_v3  ;;  %v1372_v3 = vsel %vm822_vm12, %v2760_v50, 0.0  ;;  %v1327_v11 = vsel %vm822_vm12, %v1703_v63, 0.0 }
 0x1fc   : > { %v1373_v47 = vadd.f32 %v1372_v3, %v1371_v60 }
 0x1fd   : > { %vm1160_vm8 = vcmp.eq.s32.totalorder %v962_v9, %v3355_v37  ;;  %vm1264_vm9 = vcmp.ne.s32.totalorder %v962_v9, 4  ;;  %v1223_v37 = vsel %vm822_vm12, %v1207_v61, 0.0  ;;  %v2773_v9 = vld [vmem:[%s2141_s18] sm:$0xff] }
 0x1fe   : > { %v1688_v36 = vsel %vm1160_vm8, 1.0, %v3383_v51  ;;  %v1704_v1 = vsel %vm1264_vm9, 1.0, %v3383_v51  ;;  %v1423_v7 = vmul.f32 0.5, %v2773_v9 }
 0x1ff   : > { %v1208_v40 = vmul.f32 %v1688_v36, %v1656_v53  ;;  %v1312_v41 = vmul.f32 0.0, %v1704_v1  ;;  %v2780_v53 = vsel %vm392_vm10, 1.0, %v3383_v51  ;;  %v2787_v36 = vsel %vm393_vm11, 1.0, %v3383_v51 }
 0x200   : > { %v1374_v61 = vsel %vm822_vm12, %v2780_v53, 0.0  ;;  %v1376_v1 = vsel %vm822_vm12, %v2787_v36, 0.0  ;;  %v1425_v60 = vrot.slane %v1423_v7, 2 }
 0x201   : > { %v1224_v15 = vsel %vm822_vm12, %v1208_v40, 0.0  ;;  %v1328_v48 = vsel %vm822_vm12, %v1312_v41, 0.0  ;;  %v1375_v63 = vadd.f32 %v1374_v61, %v1373_v47  ;;  %v2793_v41 = vsel %vm394_vm13, 1.0, %v3383_v51 }
 0x202   : > { %v2775_v2 = vadd.f32 %v1224_v15, %v1223_v37  ;;  %v2777_v39 = vadd.f32 %v1328_v48, %v1327_v11  ;;  %v1378_v38 = vsel %vm822_vm12, %v2793_v41, 0.0  ;;  %v1427_v3 = vsub.f32 %v2773_v9, %v1425_v60 }
 0x203   : > { %v1377_v40 = vadd.f32 %v1376_v1, %v1375_v63  ;;  %v1428_v37 = vadd.f32 %v1425_v60, %v2773_v9  ;;  %v974_v11 = vcvt.f32.s32 %v2478_v56  ;;  %v1002_v15 = vcvt.f32.s32 %v2486_v59 }
 0x204   : > { %v1380_v47 = vsel %vm822_vm12, %v2806_v54, 0.0  ;;  %v1016_v56 = vcvt.f32.s32 %v2488_v27  ;;  %v1434_v6 = vrot.slane %v1427_v3, 4  ;;  %v2824_v61 = vsel %vm396_vm15, 1.0, %v3383_v51 }
 0x205   : > { %v1379_v48 = vadd.f32 %v1378_v38, %v1377_v40  ;;  %v1430_v52 = vrot.slane %v1428_v37, 4  ;;  %v2816_v59 = vshll.u32 %v974_v11, 16  ;;  %v2821_v0 = vshll.u32 %v1002_v15, 16  ;;  %3384 = vst [vmem:[#allocation23_spill] sm:$0xff] %v2824_v61 }
 0x206   : > { %v1030_v27 = vcvt.f32.s32 %v2490_v29  ;;  %v1382_v34 = vsel %vm822_vm12, %v2824_v61, 0.0  ;;  %v1454_v63 = vmin.f32 %v1427_v3, %v1434_v6  ;;  %v2830_v1 = vshll.u32 %v1016_v56, 16 }
 0x207   : > { %v1381_v30 = vadd.f32 %v1380_v47, %v1379_v48  ;;  %v1453_v7 = vmax.f32 %v1428_v37, %v1430_v52  ;;  %v1432_v60 = vmin.f32 %v1428_v37, %v1430_v52  ;;  %v1436_v40 = vmax.f32 %v1427_v3, %v1434_v6  ;;  %v2840_v47 = vpop.xlane.xlu1 %678  ;;  %v1838_v52 = vpop.eup %1837 }
 0x208   : > { %v1058_v38 = vcvt.f32.s32 %v2494_v20  ;;  %v1072_v11 = vcvt.f32.s32 %v2496_v45  ;;  %v1086_v29 = vcvt.f32.s32 %v2498_v44  ;;  %v1443_v8 = vsub.f32 %v1428_v37, %v1427_v3 }
 0x209   : > { %v1100_v15 = vcvt.f32.s32 %v2502_v19  ;;  %v1114_v48 = vcvt.f32.s32 %v2504_v25  ;;  %v1383_v55 = vadd.f32 %v1382_v34, %v1381_v30  ;;  %v2845_v56 = vsel %vm397_vm0, 1.0, %v3383_v51  ;;  %v1840_v19 = vpop.eup %1839 }
 0x20a   : > { %3385 = vst [vmem:[#allocation34_spill] sm:$0xff] %v2845_v56  ;;  %v1128_v20 = vcvt.f32.s32 %v2518_v26  ;;  %v1384_v45 = vsel %vm822_vm12, %v2845_v56, 0.0  ;;  %v1455_v44 = vsub.f32 %v1453_v7, %v1454_v63  ;;  %v2852_v25 = vshll.u32 %v1030_v27, 16  ;;  %v1842_v6 = vpop.eup %1841 }
 0x20b   : > { %v2854_v3 = vshll.u32 %v1044_v13, 16  ;;  %v1437_v37 = vsub.f32 %v1432_v60, %v1436_v40  ;;  %v2857_v30 = vshll.u32 %v1058_v38, 16  ;;  %v2859_v34 = vshll.u32 %v1072_v11, 16  ;;  %v1844_v17 = vpop.eup %1843 }
 0x20c   : > { %v1156_v26 = vcvt.f32.s32 %v2531_v46  ;;  %v1445_v10 = vrot.slane %v1443_v8, 1  ;;  %v2862_v61 = vshll.u32 %v1086_v29, 16  ;;  %v2864_v7 = vshll.u32 %v1100_v15, 16  ;;  %v1846_v60 = vpop.eup %1845 }
 0x20d   : > { %v1385_v13 = vadd.f32 %v1384_v45, %v1383_v55  ;;  %v2875_v40 = vshll.u32 %v1114_v48, 16  ;;  %v2877_v46 = vshll.u32 %v1128_v20, 16  ;;  %v1386_v38 = vsel %vm822_vm12, %v2873_v35, 0.0 }
 0x20e   : > { %3386 = vst [vmem:[#allocation37_spill] sm:$0xff] %v2862_v61  ;;  %3387 = vst [vmem:[#allocation29_spill] sm:$0xff] %v2864_v7  ;;  %v1457_v11 = vrot.slane %v1455_v44, 1  ;;  %v2881_v29 = vshll.u32 %v1142_v24, 16  ;;  %v697_v15 = vmul.f32 0.6931472, %v1838_v52  ;;  %v1447_v61 = vmul.f32 %v1445_v10, %v1443_v8 }
 0x20f   : > { %3388 = vst [vmem:[#allocation28_spill] sm:$0xff] %v2875_v40  ;;  %3389 = vst [vmem:[#allocation36_spill] sm:$0xff] %v2877_v46  ;;  %v1438_v55 = vmax.f32 %v1437_v37, 0.0  ;;  %v2884_v45 = vshll.u32 %v1156_v26, 16  ;;  %v707_v28 = vmul.f32 0.6931472, %v1840_v19  ;;  %v1387_v46 = vadd.f32 %v1386_v38, %v1385_v13 }
 0x210   : > { %3390 = vst [vmem:[#allocation31_spill] sm:$0xff] %v2881_v29  ;;  %v695_v7 = vmul.f32 0.6931472, %v1842_v6  ;;  %v699_v56 = vmul.f32 0.6931472, %v1844_v17  ;;  %v2891_v24 = vsel %vm399_vm2, 1.0, %v3383_v51  ;;  %v2896_v19 = vmul.f32 %v1457_v11, %v1455_v44  ;;  %v1848_v6 = vpop.eup %1847 }
 0x211   : > { %3391 = vst [vmem:[#allocation39_spill] sm:$0xff] %v2884_v45  ;;  %v701_v48 = vmul.f32 0.6931472, %v1846_v60  ;;  %v1388_v52 = vsel %vm822_vm12, %v2891_v24, 0.0  ;;  %v3392_v8 = vld [vmem:[#allocation11_spill] sm:$0xff]  ;;  %v2904_v37 = vsel %vm400_vm3, 1.0, %v3383_v51 }
 0x212   : > { %v2899_v17 = vadd.f32 %v697_v15, %v3392_v8  ;;  %v1440_v49 = vrot.slane %v1438_v55, 1  ;;  %v3393_v26 = vld [vmem:[#allocation9_spill] sm:$0xff]  ;;  %v3394_v13 = vld [vmem:[#allocation15_spill] sm:$0xff]  ;;  %v1449_v38 = vrot.slane %v1447_v61, 4  ;;  %v2919_v15 = vadd.f32 %v699_v56, %v3395_v22 }
 0x213   : > { %v2912_v10 = vadd.f32 %v695_v7, %v3393_v26  ;;  %v2916_v60 = vadd.f32 %v707_v28, %v3394_v13  ;;  %v2924_v8 = vadd.f32 %v701_v48, %v3396_v14  ;;  %v1408_v45 = vrot.slane %v2773_v9, 4 }
 0x214   : > { %v2930_v7 = vsel %vm402_vm5, 1.0, %v3383_v51  ;;  %vm1465_vm8 = vcmp.gt.f32.partialorder %v2896_v19, 0.0  ;;  %v703_v56 = vmul.f32 0.6931472, %v1848_v6  ;;  %v2936_v26 = vmul.f32 %v1440_v49, %v1438_v55 }
 0x215   : > { %3397 = vst [vmem:[#allocation38_spill] sm:$0xff] %v2930_v7  ;;  %v1451_v14 = vadd.f32 %v1449_v38, %v1447_v61  ;;  %v1850_v7 = vpop.eup %1849  ;;  %v1389_v6 = vadd.f32 %v1388_v52, %v1387_v46  ;;  %v1390_v29 = vsel %vm822_vm12, %v2904_v37, 0.0  ;;  %v1467_v55 = vsel %vm1465_vm8, %v2896_v19, 1.0  ;;  %v1874_v61 = vld [vmem:[%s2388_s22 + $0x18] sm:$0xff] }
 0x216   : > { %v1852_v52 = vpop.eup %1851  ;;  %v705_v38 = vmul.f32 0.6931472, %v1850_v7  ;;  %1853 = vrcp.f32 %v1467_v55 }
 0x217   : > { %1855 = vlog2.f32 %v2840_v47 }
 0x21a   : > { %v2866_v27 = vpop.xlane.xlu1 %760  ;;  %v2868_v63 = vpop.xlane.xlu0 %758 }
 0x21b   : > { %v790_v55 = vsub.f32 %v2912_v10, %v2868_v63 }
 0x21e   : > { %v2886_v40 = vpop.xlane.xlu1 %680  ;;  %v972_v20 = vpop.xlane.xlu0 %971 }
 0x21f   : > { %v973_v21 = vcvt.f32.s32 %v972_v20  ;;  %1857 = vlog2.f32 %v2886_v40 }
 0x221   : > { %v976_v44 = vadd.s32 %v2816_v59, %v973_v21  ;;  %v1873_v59 = vld [vmem:[%s2388_s22 + $0x10] sm:$0xff] }
 0x222   : > { %v986_v11 = vpop.xlane.xlu1 %985  ;;  %v2921_v20 = vpop.xlane.xlu0 %762 }
 0x223   : > { %vm1161_vm6 = vcmp.eq.s32.totalorder %v976_v44, %v1873_v59  ;;  %vm1265_vm7 = vcmp.ne.s32.totalorder %v976_v44, 4  ;;  %v987_v28 = vcvt.f32.s32 %v986_v11  ;;  %v2943_v11 = vsub.f32 %v2773_v9, %v1408_v45 }
 0x224   : > { %v1689_v21 = vsel %vm1161_vm6, 1.0, %v3383_v51  ;;  %v1705_v48 = vsel %vm1265_vm7, 1.0, %v3383_v51  ;;  %v792_v47 = vsub.f32 %v2919_v15, %v2921_v20  ;;  %v806_v20 = vmul.f32 %v790_v55, %v2608_v5 }
 0x225   : > { %v1209_v13 = vmul.f32 %v1689_v21, %v2754_v18  ;;  %v1313_v22 = vmul.f32 0.0, %v1705_v48  ;;  %v990_v4 = vadd.s32 %v2819_v33, %v987_v28  ;;  %v2959_v48 = vsub.f32 %v1451_v14, %v2936_v26 }
 0x226   : > { %v2940_v59 = vpop.xlane.xlu1 %764  ;;  %v683_v44 = vpop.xlane.xlu0 %682  ;;  %v1392_v14 = vsel %vm822_vm12, %v2909_v12, 0.0 }
 0x227   : > { %v1226_v18 = vsel %vm822_vm12, %v1209_v13, 0.0  ;;  %v1330_v33 = vsel %vm822_vm12, %v1313_v22, 0.0  ;;  %vm1162_vm9 = vcmp.eq.s32.totalorder %v990_v4, %v1874_v61  ;;  %vm1266_vm10 = vcmp.ne.s32.totalorder %v990_v4, 4  ;;  %v3398_v61 = vld [vmem:[#allocation13_spill] sm:$0xff] }
 0x228   : > { %v1227_v49 = vadd.f32 %v1226_v18, %v2775_v2  ;;  %v1331_v9 = vadd.f32 %v1330_v33, %v2777_v39  ;;  %v1690_v46 = vsel %vm1162_vm9, 1.0, %v3383_v51  ;;  %v1706_v45 = vsel %vm1266_vm10, 1.0, %v3383_v51  ;;  %v2966_v39 = vld [vmem:[%s2388_s22 + $0x78] sm:$0xff] }
 0x229   : > { %v1210_v28 = vmul.f32 %v1690_v46, %v2760_v50  ;;  %v1314_v21 = vmul.f32 0.0, %v1706_v45  ;;  %v2962_v4 = vadd.f32 %v703_v56, %v3398_v61  ;;  %vm403_vm11 = vcmp.ne.s32.totalorder %v2966_v39, 4  ;;  %v3399_v61 = vld [vmem:[#allocation14_spill] sm:$0xff] }
 0x22a   : > { %v685_v13 = vpop.xlane.xlu1 %684  ;;  %v1000_v22 = vpop.xlane.xlu0 %999  ;;  %v1391_v18 = vadd.f32 %v1390_v29, %v1389_v6  ;;  %v709_v33 = vmul.f32 0.6931472, %v1852_v52  ;;  %v2975_v2 = vadd.f32 %v705_v38, %v3399_v61  ;;  %v2978_v29 = vsel %vm403_vm11, 1.0, %v3383_v51 }
 0x22b   : > { %v1228_v7 = vsel %vm822_vm12, %v1210_v28, 0.0  ;;  %v1332_v50 = vsel %vm822_vm12, %v1314_v21, 0.0  ;;  %v1001_v56 = vcvt.f32.s32 %v1000_v22  ;;  %vm1460_vm13 = vcmp.gt.f32.partialorder %v2959_v48, 0.0  ;;  %v1876_v22 = vld [vmem:[%s2388_s22 + $0x20] sm:$0xff] }
 0x22c   : > { %v1229_v46 = vadd.f32 %v1228_v7, %v1227_v49  ;;  %v1333_v45 = vadd.f32 %v1332_v50, %v1331_v9  ;;  %v791_v6 = vsub.f32 %v2899_v17, %v2866_v27  ;;  %v2986_v28 = vadd.f32 %v1392_v14, %v1391_v18  ;;  %v3400_v27 = vld [vmem:[#allocation16_spill] sm:$0xff] }
 0x22d   : > { %v1004_v49 = vadd.s32 %v2821_v0, %v1001_v56  ;;  %v1466_v21 = vsub.f32 %v2896_v19, %v2959_v48  ;;  %v2995_v63 = vadd.f32 %v709_v33, %v3400_v27  ;;  %v1461_v0 = vsel %vm1460_vm13, %v2959_v48, 1.0  ;;  %v1877_v56 = vld [vmem:[%s2388_s22 + $0x28] sm:$0xff] }
 0x22e   : > { %v1014_v9 = vpop.xlane.xlu1 %1013  ;;  %v767_v52 = vpop.xlane.xlu0 %766  ;;  %1859 = vlog2.f32 %v683_v44  ;;  %v807_v15 = vmul.f32 %v791_v6, %v2605_v16  ;;  %v808_v33 = vmul.f32 %v792_v47, %v2621_v23  ;;  %v793_v44 = vsub.f32 %v2924_v8, %v2940_v59 }
 0x22f   : > { %v1015_v38 = vcvt.f32.s32 %v1014_v9  ;;  %vm1163_vm14 = vcmp.eq.s32.totalorder %v1004_v49, %v1876_v22  ;;  %vm1267_vm15 = vcmp.ne.s32.totalorder %v1004_v49, 4  ;;  %1861 = vlog2.f32 %v685_v13 }
 0x230   : > { %v1691_v40 = vsel %vm1163_vm14, 1.0, %v3383_v51  ;;  %v1707_v17 = vsel %vm1267_vm15, 1.0, %v3383_v51  ;;  %v824_v49 = vsel %vm822_vm12, %v807_v15, 0.0  ;;  %v823_v8 = vsel %vm822_vm12, %v806_v20, 0.0 }
 0x231   : > { %v1018_v10 = vadd.s32 %v2830_v1, %v1015_v38  ;;  %v1211_v18 = vmul.f32 %v1691_v40, %v2780_v53  ;;  %v1315_v7 = vmul.f32 0.0, %v1707_v17  ;;  %v1854_v53 = vpop.eup %1853  ;;  %v794_v9 = vsub.f32 %v2962_v4, %v767_v52 }
 0x232   : > { %v769_v50 = vpop.xlane.xlu1 %768  ;;  %v687_v14 = vpop.xlane.xlu0 %686  ;;  %v809_v27 = vmul.f32 %v793_v44, %v2630_v57  ;;  %v825_v57 = vadd.f32 %v824_v49, %v823_v8  ;;  %v1396_v19 = vsel %vm822_vm12, %v2978_v29, 0.0 }
 0x233   : > { %vm1164_vm0 = vcmp.eq.s32.totalorder %v1018_v10, %v1877_v56  ;;  %vm1268_vm1 = vcmp.ne.s32.totalorder %v1018_v10, 4  ;;  %v1230_v61 = vsel %vm822_vm12, %v1211_v18, 0.0  ;;  %v1334_v1 = vsel %vm822_vm12, %v1315_v7, 0.0  ;;  %v1856_v22 = vpop.eup %1855 }
 0x234   : > { %v1692_v16 = vsel %vm1164_vm0, 1.0, %v3383_v51  ;;  %v1708_v5 = vsel %vm1268_vm1, 1.0, %v3383_v51  ;;  %v1231_v6 = vadd.f32 %v1230_v61, %v1229_v46  ;;  %v1335_v55 = vadd.f32 %v1334_v1, %v1333_v45  ;;  %v1858_v17 = vpop.eup %1857 }
 0x235   : > { %v1212_v23 = vmul.f32 %v1692_v16, %v2787_v36  ;;  %v1316_v59 = vmul.f32 0.0, %v1708_v5  ;;  %1863 = vlog2.f32 %v687_v14  ;;  %v3021_v36 = vmul.f32 %v1854_v53, %v1466_v21  ;;  %v1878_v21 = vld [vmem:[%s2388_s22 + $0x30] sm:$0xff] }
 0x236   : > { %v689_v47 = vpop.xlane.xlu1 %688  ;;  %v1028_v38 = vpop.xlane.xlu0 %1027  ;;  %1865 = vrcp.f32 %v1461_v0  ;;  %v826_v10 = vsel %vm822_vm12, %v808_v33, 0.0  ;;  %v711_v15 = vmul.f32 0.6931472, %v1856_v22  ;;  %v810_v20 = vmul.f32 %v794_v9, %v2640_v42 }
 0x237   : > { %v1232_v40 = vsel %vm822_vm12, %v1212_v23, 0.0  ;;  %v1029_v13 = vcvt.f32.s32 %v1028_v38  ;;  %v1336_v45 = vsel %vm822_vm12, %v1316_v59, 0.0  ;;  %1867 = vlog2.f32 %v689_v47  ;;  %v1879_v47 = vld [vmem:[%s2388_s22 + $0x38] sm:$0xff] }
 0x238   : > { %v1233_v46 = vadd.f32 %v1232_v40, %v1231_v6  ;;  %v1337_v4 = vadd.f32 %v1336_v45, %v1335_v55  ;;  %v795_v18 = vsub.f32 %v2975_v2, %v769_v50  ;;  %v1860_v44 = vpop.eup %1859  ;;  %v828_v0 = vsel %vm822_vm12, %v809_v27, 0.0 }
 0x239   : > { %v1032_v52 = vadd.s32 %v2852_v25, %v1029_v13  ;;  %v713_v33 = vmul.f32 0.6931472, %v1858_v17  ;;  %v827_v61 = vadd.f32 %v826_v10, %v825_v57  ;;  %v715_v53 = vmul.f32 0.6931472, %v1860_v44  ;;  %v1862_v8 = vpop.eup %1861 }
 0x23a   : > { %v1042_v7 = vpop.xlane.xlu1 %1041  ;;  %v771_v14 = vpop.xlane.xlu0 %770  ;;  %v830_v6 = vsel %vm822_vm12, %v810_v20, 0.0  ;;  %v811_v55 = vmul.f32 %v795_v18, %v2650_v32  ;;  %v717_v17 = vmul.f32 0.6931472, %v1862_v8 }
 0x23b   : > { %vm1165_vm2 = vcmp.eq.s32.totalorder %v1032_v52, %v1878_v21  ;;  %vm1269_vm3 = vcmp.ne.s32.totalorder %v1032_v52, 4  ;;  %v1043_v56 = vcvt.f32.s32 %v1042_v7  ;;  %v796_v50 = vsub.f32 %v2916_v60, %v771_v14 }
 0x23c   : > { %v1693_v25 = vsel %vm1165_vm2, 1.0, %v3383_v51  ;;  %v1709_v1 = vsel %vm1269_vm3, 1.0, %v3383_v51  ;;  %v829_v5 = vadd.f32 %v828_v0, %v827_v61  ;;  %v832_v52 = vsel %vm822_vm12, %v811_v55, 0.0  ;;  %v3401_v0 = vld [vmem:[#allocation19_spill] sm:$0xff] }
 0x23d   : > { %v1213_v42 = vmul.f32 %v1693_v25, %v2793_v41  ;;  %v1317_v16 = vmul.f32 0.0, %v1709_v1  ;;  %v1046_v2 = vadd.s32 %v2854_v3, %v1043_v56  ;;  %v812_v40 = vmul.f32 %v796_v50, %v2660_v31  ;;  %v3402_v56 = vld [vmem:[#allocation20_spill] sm:$0xff] }
 0x23e   : > { %v773_v23 = vpop.xlane.xlu1 %772  ;;  %v691_v49 = vpop.xlane.xlu0 %690  ;;  %v831_v10 = vadd.f32 %v830_v6, %v829_v5  ;;  %v734_v21 = vadd.f32 %v711_v15, %v3401_v0  ;;  %v735_v61 = vadd.f32 %v713_v33, %v3402_v56  ;;  %v3403_v50 = vld [vmem:[#allocation24_spill] sm:$0xff]  ;;  %v1880_v33 = vld [vmem:[%s2388_s22 + $0x40] sm:$0xff] }
 0x23f   : > { %v1234_v59 = vsel %vm822_vm12, %v1213_v42, 0.0  ;;  %v1338_v9 = vsel %vm822_vm12, %v1317_v16, 0.0  ;;  %vm1166_vm4 = vcmp.eq.s32.totalorder %v1046_v2, %v1879_v47  ;;  %vm1270_vm5 = vcmp.ne.s32.totalorder %v1046_v2, 4  ;;  %v1864_v22 = vpop.eup %1863 }
 0x240   : > { %v1235_v41 = vadd.f32 %v1234_v59, %v1233_v46  ;;  %v1339_v3 = vadd.f32 %v1338_v9, %v1337_v4  ;;  %v1694_v60 = vsel %vm1166_vm4, 1.0, %v3383_v51  ;;  %v1710_v38 = vsel %vm1270_vm5, 1.0, %v3383_v51  ;;  %v1866_v45 = vpop.eup %1865 }
 0x241   : > { %v1214_v27 = vmul.f32 %v1694_v60, %v2806_v54  ;;  %v1318_v32 = vmul.f32 0.0, %v1710_v38  ;;  %v797_v13 = vsub.f32 %v2995_v63, %v773_v23  ;;  %1869 = vlog2.f32 %v691_v49  ;;  %v1868_v57 = vpop.eup %1867  ;;  %v3404_v49 = vld [vmem:[#allocation26_spill] sm:$0xff] }
 0x242   : > { %v693_v46 = vpop.xlane.xlu1 %692  ;;  %v1056_v4 = vpop.xlane.xlu0 %1055  ;;  %v719_v20 = vmul.f32 0.6931472, %v1864_v22  ;;  %v834_v44 = vsel %vm822_vm12, %v812_v40, 0.0  ;;  %v3052_v25 = vmul.f32 %v1866_v45, %v2936_v26  ;;  %v833_v1 = vadd.f32 %v832_v52, %v831_v10  ;;  %v1881_v40 = vld [vmem:[%s2388_s22 + $0x48] sm:$0xff] }
 0x243   : > { %v1236_v18 = vsel %vm822_vm12, %v1214_v27, 0.0  ;;  %v1340_v7 = vsel %vm822_vm12, %v1318_v32, 0.0  ;;  %v813_v54 = vmul.f32 %v797_v13, %v2669_v58  ;;  %1871 = vlog2.f32 %v693_v46  ;;  %v3406_v27 = vld [vmem:[#allocation30_spill] sm:$0xff] }
 0x244   : > { %v1237_v14 = vadd.f32 %v1236_v18, %v1235_v41  ;;  %v1341_v31 = vadd.f32 %v1340_v7, %v1339_v3  ;;  %v1057_v63 = vcvt.f32.s32 %v1056_v4  ;;  %v721_v42 = vmul.f32 0.6931472, %v1868_v57  ;;  %v3405_v41 = vld [vmem:[#allocation23_spill] sm:$0xff]  ;;  %v3407_v57 = vld [vmem:[#allocation34_spill] sm:$0xff] }
 0x245   : > { %v736_v5 = vadd.f32 %v715_v53, %v3403_v50  ;;  %v836_v6 = vsel %vm822_vm12, %v813_v54, 0.0  ;;  %v3058_v8 = vadd.f32 %v717_v17, %v3404_v49  ;;  %v835_v15 = vadd.f32 %v834_v44, %v833_v1  ;;  %v1882_v50 = vld [vmem:[%s2388_s22 + $0x50] sm:$0xff] }
 0x246   : > { %v1060_v16 = vadd.s32 %v2857_v30, %v1057_v63  ;;  %v1070_v2 = vpop.xlane.xlu1 %1069  ;;  %v775_v58 = vpop.xlane.xlu0 %774  ;;  %v3062_v26 = vadd.f32 %v719_v20, %v2328_v62  ;;  %v3070_v32 = vadd.f32 %v721_v42, %v3406_v27  ;;  %v3408_v63 = vld [vmem:[#allocation37_spill] sm:$0xff] }
 0x247   : > { %v1071_v55 = vcvt.f32.s32 %v1070_v2  ;;  %v798_v23 = vsub.f32 %v734_v21, %v775_v58  ;;  %v837_v47 = vadd.f32 %v836_v6, %v835_v15 }
 0x248   : > { %vm1167_vm6 = vcmp.eq.s32.totalorder %v1060_v16, %v1880_v33  ;;  %vm1271_vm7 = vcmp.ne.s32.totalorder %v1060_v16, 4  ;;  %v3410_v33 = vld [vmem:[#allocation29_spill] sm:$0xff] }
 0x249   : > { %v1695_v30 = vsel %vm1167_vm6, 1.0, %v3383_v51  ;;  %v1711_v59 = vsel %vm1271_vm7, 1.0, %v3383_v51  ;;  %v1074_v53 = vadd.s32 %v2859_v34, %v1071_v55  ;;  %v814_v9 = vmul.f32 %v798_v23, %v2679_v43 }
 0x24a   : > { %v1215_v3 = vmul.f32 %v1695_v30, %v3405_v41  ;;  %v1319_v60 = vmul.f32 0.0, %v1711_v59  ;;  %v1084_v38 = vpop.xlane.xlu1 %1083  ;;  %v777_v22 = vpop.xlane.xlu0 %776 }
 0x24b   : > { %vm1168_vm9 = vcmp.eq.s32.totalorder %v1074_v53, %v1881_v40  ;;  %vm1272_vm10 = vcmp.ne.s32.totalorder %v1074_v53, 4  ;;  %v838_v62 = vsel %vm822_vm12, %v814_v9, 0.0  ;;  %v1085_v13 = vcvt.f32.s32 %v1084_v38  ;;  %v1870_v45 = vpop.eup %1869  ;;  %v1883_v40 = vld [vmem:[%s2388_s22 + $0x58] sm:$0xff] }
 0x24c   : > { %v1238_v34 = vsel %vm822_vm12, %v1215_v3, 0.0  ;;  %v1342_v43 = vsel %vm822_vm12, %v1319_v60, 0.0  ;;  %v1696_v17 = vsel %vm1168_vm9, 1.0, %v3383_v51  ;;  %v1712_v10 = vsel %vm1272_vm10, 1.0, %v3383_v51  ;;  %v3412_v60 = vld [vmem:[#allocation32_spill] sm:$0xff] }
 0x24d   : > { %v723_v52 = vmul.f32 0.6931472, %v1870_v45  ;;  %v1239_v46 = vadd.f32 %v1238_v34, %v1237_v14  ;;  %v1343_v4 = vadd.f32 %v1342_v43, %v1341_v31  ;;  %v1216_v20 = vmul.f32 %v1696_v17, %v3407_v57  ;;  %v1872_v18 = vpop.eup %1871  ;;  %v3413_v17 = vld [vmem:[#allocation28_spill] sm:$0xff] }
 0x24e   : > { %v1320_v7 = vmul.f32 0.0, %v1712_v10  ;;  %v839_v54 = vadd.f32 %v838_v62, %v837_v47  ;;  %v1088_v44 = vadd.s32 %v3408_v63, %v1085_v13  ;;  %v799_v0 = vsub.f32 %v735_v61, %v777_v22  ;;  %v1098_v21 = vpop.xlane.xlu1 %1097  ;;  %v779_v56 = vpop.xlane.xlu0 %778  ;;  %v3409_v61 = vld [vmem:[#allocation17_spill] sm:$0xff] }
 0x24f   : > { %v725_v1 = vmul.f32 0.6931472, %v1872_v18  ;;  %v1240_v42 = vsel %vm822_vm12, %v1216_v20, 0.0  ;;  %v1099_v16 = vcvt.f32.s32 %v1098_v21  ;;  %v800_v2 = vsub.f32 %v736_v5, %v779_v56  ;;  %v3411_v5 = vld [vmem:[#allocation21_spill] sm:$0xff]  ;;  %v3414_v20 = vld [vmem:[#allocation18_spill] sm:$0xff] }
 0x250   : > { %v1241_v58 = vadd.f32 %v1240_v42, %v1239_v46  ;;  %v1344_v14 = vsel %vm822_vm12, %v1320_v7, 0.0  ;;  %vm1169_vm11 = vcmp.eq.s32.totalorder %v1088_v44, %v1882_v50  ;;  %vm1273_vm14 = vcmp.ne.s32.totalorder %v1088_v44, 4  ;;  %v1884_v63 = vld [vmem:[%s2388_s22 + $0x60] sm:$0xff] }
 0x251   : > { %v1345_v31 = vadd.f32 %v1344_v14, %v1343_v4  ;;  %v1697_v6 = vsel %vm1169_vm11, 1.0, %v3383_v51  ;;  %v1713_v55 = vsel %vm1273_vm14, 1.0, %v3383_v51  ;;  %v815_v23 = vmul.f32 %v799_v0, %v3409_v61 }
 0x252   : > { %v1217_v49 = vmul.f32 %v1697_v6, %v2873_v35  ;;  %v1321_v15 = vmul.f32 0.0, %v1713_v55  ;;  %v1102_v30 = vadd.s32 %v3410_v33, %v1099_v16  ;;  %v816_v59 = vmul.f32 %v800_v2, %v3411_v5  ;;  %v1112_v53 = vpop.xlane.xlu1 %1111  ;;  %v781_v9 = vpop.xlane.xlu0 %780  ;;  %v3416_v55 = vld [vmem:[#allocation25_spill] sm:$0xff] }
 0x253   : > { %v840_v47 = vsel %vm822_vm12, %v815_v23, 0.0  ;;  %v1113_v41 = vcvt.f32.s32 %v1112_v53  ;;  %v801_v3 = vsub.f32 %v3058_v8, %v781_v9  ;;  %v3092_v38 = vadd.f32 %v723_v52, %v3412_v60 }
 0x254   : > { %v1242_v22 = vsel %vm822_vm12, %v1217_v49, 0.0  ;;  %v1346_v27 = vsel %vm822_vm12, %v1321_v15, 0.0  ;;  %v841_v35 = vadd.f32 %v840_v47, %v839_v54  ;;  %vm1170_vm15 = vcmp.eq.s32.totalorder %v1102_v30, %v1883_v40  ;;  %v3417_v15 = vld [vmem:[#allocation33_spill] sm:$0xff] }
 0x255   : > { %v1243_v62 = vadd.f32 %v1242_v22, %v1241_v58  ;;  %v1347_v13 = vadd.f32 %v1346_v27, %v1345_v31  ;;  %v1698_v45 = vsel %vm1170_vm15, 1.0, %v3383_v51  ;;  %vm1274_vm0 = vcmp.ne.s32.totalorder %v1102_v30, 4  ;;  %v3415_v31 = vld [vmem:[#allocation36_spill] sm:$0xff] }
 0x256   : > { %v1218_v34 = vmul.f32 %v1698_v45, %v2891_v24  ;;  %v1714_v8 = vsel %vm1274_vm0, 1.0, %v3383_v51  ;;  %v842_v43 = vsel %vm822_vm12, %v816_v59, 0.0  ;;  %v1116_v10 = vadd.s32 %v3413_v17, %v1113_v41  ;;  %v1126_v52 = vpop.xlane.xlu1 %1125  ;;  %v783_v46 = vpop.xlane.xlu0 %782  ;;  %v1885_v59 = vld [vmem:[%s2388_s22 + $0x68] sm:$0xff] }
 0x257   : > { %v1322_v4 = vmul.f32 0.0, %v1714_v8  ;;  %v843_v57 = vadd.f32 %v842_v43, %v841_v35  ;;  %v817_v18 = vmul.f32 %v801_v3, %v3414_v20  ;;  %v1127_v7 = vcvt.f32.s32 %v1126_v52  ;;  %v3419_v35 = vld [vmem:[#allocation22_spill] sm:$0xff] }
 0x258   : > { %v1244_v54 = vsel %vm822_vm12, %v1218_v34, 0.0  ;;  %vm1171_vm1 = vcmp.eq.s32.totalorder %v1116_v10, %v1884_v63  ;;  %vm1275_vm2 = vcmp.ne.s32.totalorder %v1116_v10, 4  ;;  %v802_v24 = vsub.f32 %v3062_v26, %v783_v46  ;;  %v3422_v63 = vld [vmem:[#allocation38_spill] sm:$0xff] }
 0x259   : > { %v1348_v44 = vsel %vm822_vm12, %v1322_v4, 0.0  ;;  %v1699_v0 = vsel %vm1171_vm1, 1.0, %v3383_v51  ;;  %v1715_v21 = vsel %vm1275_vm2, 1.0, %v3383_v51  ;;  %v844_v56 = vsel %vm822_vm12, %v817_v18, 0.0  ;;  %v3421_v4 = vld [vmem:[#allocation35_spill] sm:$0xff] }
 0x25a   : > { %v1349_v42 = vadd.f32 %v1348_v44, %v1347_v13  ;;  %v1219_v16 = vmul.f32 %v1699_v0, %v2904_v37  ;;  %v1323_v2 = vmul.f32 0.0, %v1715_v21  ;;  %v845_v58 = vadd.f32 %v844_v56, %v843_v57  ;;  %v1140_v14 = vpop.xlane.xlu1 %1139  ;;  %v785_v50 = vpop.xlane.xlu0 %784  ;;  %v1886_v13 = vld [vmem:[%s2388_s22 + $0x70] sm:$0xff]  ;;  %s1921_s22 = sshll.u32 %s2005_s15, 4  ;;  %s1922_s22 = int_to_ptr.vmem [resolvable:$false] %s1921_s22 }
 0x25b   : > { %v1130_v6 = vadd.s32 %v3415_v31, %v1127_v7  ;;  %v818_v26 = vmul.f32 %v802_v24, %v3416_v55  ;;  %v1141_v61 = vcvt.f32.s32 %v1140_v14  ;;  %v803_v23 = vsub.f32 %v3070_v32, %v785_v50  ;;  %v3418_v32 = vld [vmem:[#allocation31_spill] sm:$0xff]  ;;  %p1924_p13 = scmp.lt.s32.totalorder %s3178_s8, %s1922_s22 }
 0x25c   : > { %v1350_v49 = vsel %vm822_vm12, %v1323_v2, 0.0  ;;  %v741_v33 = vadd.f32 %v725_v1, %v3417_v15  ;;  %v1245_v30 = vadd.f32 %v1244_v54, %v1243_v62  ;;  %v1246_v5 = vsel %vm822_vm12, %v1219_v16, 0.0  ;;  %v3423_v56 = vld [vmem:[#allocation27_spill] sm:$0xff] }
 0x25d   : > { %v1351_v37 = vadd.f32 %v1350_v49, %v1349_v42  ;;  %vm1172_vm3 = vcmp.eq.s32.totalorder %v1130_v6, %v1885_v59  ;;  %vm1276_vm4 = vcmp.ne.s32.totalorder %v1130_v6, 4  ;;  %v846_v53 = vsel %vm822_vm12, %v818_v26, 0.0 }
 0x25e   : > { %v1700_v9 = vsel %vm1172_vm3, 1.0, %v3383_v51  ;;  %v1716_v47 = vsel %vm1276_vm4, 1.0, %v3383_v51  ;;  %v847_v41 = vadd.f32 %v846_v53, %v845_v58  ;;  %v1144_v3 = vadd.s32 %v3418_v32, %v1141_v61  ;;  %v1154_v60 = vpop.xlane.xlu1 %1153  ;;  %v787_v22 = vpop.xlane.xlu0 %786 }
 0x25f   : > { %v1220_v1 = vmul.f32 %v1700_v9, %v2909_v12  ;;  %v1324_v27 = vmul.f32 0.0, %v1716_v47  ;;  %v819_v40 = vmul.f32 %v803_v23, %v3419_v35  ;;  %v1155_v62 = vcvt.f32.s32 %v1154_v60  ;;  %v3420_v12 = vld [vmem:[#allocation39_spill] sm:$0xff] }
 0x260   : > { %vm1173_vm5 = vcmp.eq.s32.totalorder %v1144_v3, %v1886_v13  ;;  %vm1277_vm6 = vcmp.ne.s32.totalorder %v1144_v3, 4  ;;  %v804_v45 = vsub.f32 %v3092_v38, %v787_v22  ;;  %v1247_v34 = vadd.f32 %v1246_v5, %v1245_v30 }
 0x261   : > { %v1352_v8 = vsel %vm822_vm12, %v1324_v27, 0.0  ;;  %v1701_v43 = vsel %vm1173_vm5, 1.0, %v3383_v51  ;;  %v1717_v17 = vsel %vm1277_vm6, 1.0, %v3383_v51  ;;  %v848_v10 = vsel %vm822_vm12, %v819_v40, 0.0 }
 0x262   : > { %v1325_v52 = vmul.f32 0.0, %v1717_v17  ;;  %v1158_v46 = vadd.s32 %v3420_v12, %v1155_v62  ;;  %v820_v57 = vmul.f32 %v804_v45, %v3421_v4  ;;  %v789_v20 = vpop.xlane.xlu0 %788  ;;  %v1353_v18 = vadd.f32 %v1352_v8, %v1351_v37 }
 0x263   : > { %v805_v7 = vsub.f32 %v741_v33, %v789_v20  ;;  %v849_v54 = vadd.f32 %v848_v10, %v847_v41  ;;  %v1221_v38 = vmul.f32 %v1701_v43, %v3422_v63  ;;  %v1248_v24 = vsel %vm822_vm12, %v1220_v1, 0.0 }
 0x264   : > { %vm1174_vm7 = vcmp.eq.s32.totalorder %v1158_v46, %v2966_v39  ;;  %vm1278_vm9 = vcmp.ne.s32.totalorder %v1158_v46, 4  ;;  %v1354_v44 = vsel %vm822_vm12, %v1325_v52, 0.0  ;;  %v850_v0 = vsel %vm822_vm12, %v820_v57, 0.0 }
 0x265   : > { %v1718_v21 = vsel %vm1278_vm9, 1.0, %v3383_v51  ;;  %v821_v42 = vmul.f32 %v805_v7, %v3423_v56  ;;  %v1355_v16 = vadd.f32 %v1354_v44, %v1353_v18  ;;  %v851_v2 = vadd.f32 %v850_v0, %v849_v54 }
 0x266   : > { %v1326_v58 = vmul.f32 0.0, %v1718_v21  ;;  %v1702_v14 = vsel %vm1174_vm7, 1.0, %v3383_v51  ;;  %v1249_v50 = vadd.f32 %v1248_v24, %v1247_v34  ;;  %v1250_v31 = vsel %vm822_vm12, %v1221_v38, 0.0 }
 0x267   : > { %v852_v6 = vsel %vm822_vm12, %v821_v42, 0.0  ;;  %v1222_v39 = vmul.f32 %v1702_v14, %v2978_v29  ;;  %v1394_v55 = vsel %vm822_vm12, %v3422_v63, 0.0  ;;  %v1470_v26 = vsel %vm1465_vm8, %v3021_v36, 0.0 }
 0x268   : > { %v1356_v61 = vsel %vm822_vm12, %v1326_v58, 0.0  ;;  %v853_v23 = vadd.f32 %v852_v6, %v851_v2  ;;  %v1251_v49 = vadd.f32 %v1250_v31, %v1249_v50  ;;  %v1464_v15 = vsel %vm1460_vm13, %v3052_v25, 0.0 }
 0x269   : > { %v1357_v33 = vadd.f32 %v1356_v61, %v1355_v16  ;;  %vm1412_vm10 = vcmask 1043456   ;;  %v1252_v30 = vsel %vm822_vm12, %v1222_v39, 0.0  ;;  %v1395_v37 = vadd.f32 %v1394_v55, %v2986_v28  ;;  %v3425_v61 = vld [vmem:[#allocation8_spill] sm:$0xff] }
 0x26a   : > { %854 = vadd.xlane.f32.xlu1 %v853_v23  ;;  %v1253_v5 = vadd.f32 %v1252_v30, %v1251_v49  ;;  %v1471_v36 = vsub.f32 %v1464_v15, %v1470_v26  ;;  %v3424_v59 = vand.u32 2147483647, %v2943_v11  ;;  %vm1473_vm8 = vcmask 1040384  }
 0x26b   : > { %1358 = vadd.xlane.f32.xlu0 %v1357_v33  ;;  %v1397_v48 = vadd.f32 %v1396_v19, %v1395_v37  ;;  %vm1484_vm12 = vcmp.eq.s32.totalorder %v3425_v61, 0  ;;  %vm1487_vm13 = vcmp.eq.s32.totalorder %v3425_v61, 1  ;;  %vm1491_vm11 = vcmp.eq.s32.totalorder %v3425_v61, 2 }
 0x26c   : > { %v1413_v53 = vsel %vm1412_vm10, %v3424_v59, 0.0  ;;  %v1472_v25 = vsub.f32 1.0, %v1471_v36  ;;  %vm1495_vm14 = vcmp.eq.s32.totalorder %v3425_v61, 3  ;;  %vm1499_vm15 = vcmp.eq.s32.totalorder %v3425_v61, 4 }
 0x26d   : > { %vm1503_vm0 = vcmp.eq.s32.totalorder %v3425_v61, 5  ;;  %vm1507_vm1 = vcmp.eq.s32.totalorder %v3425_v61, 6 }
 0x26e   : > { %1254 = vadd.xlane.f32.xlu1 %v1253_v5  ;;  %v1474_v9 = vsel %vm1473_vm8, %v1472_v25, 0.0 }
 0x26f   : > { %1414 = vadd.xlane.f32.xlu0 %v1413_v53 }
 0x270   : > { %v895_v28 = vpop.xlane.xlu0 %894 }
 0x271   : > { %v896_v47 = vrot.slane %v895_v28, 4 }
 0x272   : > { %1398 = vadd.xlane.f32.xlu1 %v1397_v48 }
 0x273   : > { %v897_v29 = vadd.f32 %v896_v47, %v895_v28 }
 0x275   : > { %v898_v41 = vrot.slane %v897_v29, 2 }
 0x276   : > { %1475 = vadd.xlane.f32.xlu1 %v1474_v9 }
 0x277   : > { %v899_v35 = vadd.f32 %v898_v41, %v897_v29 }
 0x279   : > { %v900_v10 = vrot.slane %v899_v35, 1 }
 0x27b   : > { %v901_v38 = vadd.f32 %v900_v10, %v899_v35 }
 0x2f7   : > { %v855_v32 = vpop.xlane.xlu1 %854 }
 0x2f8   : > { %v856_v11 = vrot.slane %v855_v32, 4  ;;  %v1359_v3 = vpop.xlane.xlu0 %1358 }
 0x2f9   : > { %v1360_v60 = vrot.slane %v1359_v3, 4 }
 0x2fa   : > { %v857_v22 = vadd.f32 %v856_v11, %v855_v32  ;;  %v1516_v11 = vld [vmem:[%s3159_s23] sm:$0x1] }
 0x2fb   : > { %v1361_v1 = vadd.f32 %v1360_v60, %v1359_v3  ;;  %v1255_v27 = vpop.xlane.xlu1 %1254 }
 0x2fc   : > { %v858_v40 = vrot.slane %v857_v22, 2  ;;  %v1256_v62 = vrot.slane %v1255_v27, 4  ;;  %v1415_v13 = vpop.xlane.xlu0 %1414 }
 0x2fd   : > { %v1362_v45 = vrot.slane %v1361_v1, 2  ;;  %v1416_v34 = vrot.slane %v1415_v13, 4 }
 0x2fe   : > { %v1257_v8 = vadd.f32 %v1256_v62, %v1255_v27  ;;  %v859_v43 = vadd.f32 %v858_v40, %v857_v22 }
 0x2ff   : > { %v1417_v51 = vadd.f32 %v1416_v34, %v1415_v13  ;;  %v1399_v17 = vpop.xlane.xlu1 %1398  ;;  %v1363_v52 = vadd.f32 %v1362_v45, %v1361_v1 }
 0x300   : > { %v1258_v12 = vrot.slane %v1257_v8, 2  ;;  %v1400_v46 = vrot.slane %v1399_v17, 4  ;;  %v860_v4 = vrot.slane %v859_v43, 1 }
 0x301   : > { %v1418_v57 = vrot.slane %v1417_v51, 2  ;;  %v1364_v24 = vrot.slane %v1363_v52, 1 }
 0x302   : > { %v1401_v20 = vadd.f32 %v1400_v46, %v1399_v17  ;;  %v861_v18 = vadd.f32 %v860_v4, %v859_v43  ;;  %v1259_v7 = vadd.f32 %v1258_v12, %v1257_v8 }
 0x303   : > { %v1419_v54 = vadd.f32 %v1418_v57, %v1417_v51  ;;  %v1476_v63 = vpop.xlane.xlu1 %1475  ;;  %v1365_v2 = vadd.f32 %v1364_v24, %v1363_v52 }
 0x304   : > { %v1402_v44 = vrot.slane %v1401_v20, 2  ;;  %v1477_v0 = vrot.slane %v1476_v63, 4  ;;  %1724 = vpush %v861_v18  ;;  %v1260_v21 = vrot.slane %v1259_v7, 1 }
 0x305   : > { %1726 = vpush %v901_v38  ;;  %v1420_v58 = vrot.slane %v1419_v54, 1 }
 0x306   : > { %v1478_v56 = vadd.f32 %v1477_v0, %v1476_v63  ;;  %v1261_v42 = vadd.f32 %v1260_v21, %v1259_v7  ;;  %v1403_v16 = vadd.f32 %v1402_v44, %v1401_v20 }
 0x307   : > { %v1421_v39 = vadd.f32 %v1420_v58, %v1419_v54 }
 0x308   : > { %v1479_v14 = vrot.slane %v1478_v56, 2  ;;  %1728 = vpush %v1261_v42  ;;  %v1404_v50 = vrot.slane %v1403_v16, 1 }
 0x309   : > { %1730 = vpush %v1365_v2 }
 0x30a   : > { %v1480_v31 = vadd.f32 %v1479_v14, %v1478_v56  ;;  %v1405_v6 = vadd.f32 %v1404_v50, %v1403_v16 }
 0x30c   : > { %1732 = vpush %v1405_v6  ;;  %v1481_v55 = vrot.slane %v1480_v31, 1 }
 0x30d   : > { %1734 = vpush %v1421_v39 }
 0x30e   : > { %v1482_v26 = vadd.f32 %v1481_v55, %v1480_v31 }
 0x310   : > { %1736 = vpush %v1482_v26 }
 0x335   : > { %s1725_s28 = spop %1724 }
 0x336   : > { %v1485_v23 = vstv %s1725_s28  ;;  %s1727_s29 = spop %1726  ;;  %s1923_s28 = scalar_lea.vmem %s1922_s22, 32 }
 0x337   : > { %v1486_v49 = vsel %vm1484_vm12, %v1485_v23, 0.0  ;;  %v1488_v15 = vstv %s1727_s29  ;;  %p1925_p3 = scmp.lt.s32.totalorder %s1923_s28, %s1917_s21 }
 0x338   : > { %v1489_v33 = vsel %vm1487_vm13, %v1488_v15, 0.0 }
 0x339   : > { %s1729_s30 = spop %1728  ;;  %v1490_v30 = vadd.f32 %v1489_v33, %v1486_v49  ;;  %p1926_p6 = por %p1925_p3, %p1924_p13 }
 0x33a   : > { %v1492_v5 = vstv %s1729_s30  ;;  %s1731_s4 = spop %1730 }
 0x33b   : > { %v1493_v37 = vsel %vm1491_vm11, %v1492_v5, 0.0  ;;  %v1496_v19 = vstv %s1731_s4  ;;  %p1927_p4 = pnand %p1926_p6, %p1920_p7 }
 0x33c   : > { %v1494_v36 = vadd.f32 %v1493_v37, %v1490_v30  ;;  %v1497_v59 = vsel %vm1495_vm14, %v1496_v19, 0.0 }
 0x33d   : > { %s1733_s7 = spop %1732 }
 0x33e   : > { %v1498_v53 = vadd.f32 %v1497_v59, %v1494_v36  ;;  %v1500_v48 = vstv %s1733_s7  ;;  %s1735_s11 = spop %1734 }
 0x33f   : > { %v1501_v25 = vsel %vm1499_vm15, %v1500_v48, 0.0  ;;  %v1504_v9 = vstv %s1735_s11 }
 0x340   : > { %v1502_v28 = vadd.f32 %v1501_v25, %v1498_v53  ;;  %v1505_v47 = vsel %vm1503_vm0, %v1504_v9, 0.0 }
 0x341   : > { %s1737_s18 = spop %1736 }
 0x342   : > { %v1506_v29 = vadd.f32 %v1505_v47, %v1502_v28  ;;  %v1508_v41 = vstv %s1737_s18 }
 0x343   : > { %v1509_v32 = vsel %vm1507_vm1, %v1508_v41, 0.0 }
 0x344   : > { %v1510_v3 = vadd.f32 %v1509_v32, %v1506_v29 }
 0x346   : > { %v1517_v60 = vadd.f32 %v1516_v11, %v1510_v3 }
 0x348   : > { %1518 = vst [vmem:[%s3159_s23] sm:$0x1] %v1517_v60 }
 0x349   : > { %1930 = shalt.err (!%p1927_p4)
}
 0x34a   : > { %s1931_s5 = scalar_lea.hbm %s3176_s19, 16  ;;  %s1935_s30 = scalar_lea.hbm %s3229_s3, 32 }
 0x34b   : > { %p1932_p10 = scmp.ne.s32.totalorder %s3176_s19, %s1931_s5  ;;  %p1936_p2 = scmp.lt.u32.totalorder %s3176_s19, %s3229_s3 }
 0x34c   : > { %p1937_p5 = scmp.lt.u32.totalorder %s1935_s30, %s1931_s5  ;;  %p1939_p8 = scmp.lt.u32.totalorder %s1931_s5, %s3176_s19 }
 0x34d   : > { %p1933_p12 = pnand %p1932_p10, %p3426_p11 }
 0x34e   : > { %p1938_p9 = por %p1937_p5, %p1936_p2 }
 0x34f   : > { %p1934_p1 = pneg %p1933_p12 }
 0x350   : > { %p1940_p0 = por %p1939_p8, %p1938_p9 }
 0x352   : > { %p1941_p7 = pnand %p1940_p0, %p1934_p1 }
 0x354   : > { %1944 = shalt.err (!%p1941_p7)
}
 0x355   : > { %1740 = dma.vmem_to_hbm [thread:$0]  (%p3426_p11), %s3178_s8, 16, %s3176_s19, %s1520_s24  }
 0x356 PF: > { %s1544_s11 = sand.u32 1, %s1979_s12   ;;  %p3427_p13 = scmp.ne.s32.totalorder %s3304_s27, 0 }
 0x357   : > { %p3428_p3 = scmp.ge.s32.totalorder %s1999_s17, 2  ;;  %s1545_s18 = scalar_lea.sflag [#allocation4], %s1544_s11 }
 0x359   : > { %p1747_p6 = pnand %p3428_p3, %p3427_p13 }
 0x35b   : > { %1974 = dma.done.wait (!%p1747_p6), %s1545_s18, 16  }
 0x35c   : > { %1976 = vsyncadd (!%p1747_p6), %s1545_s18, 4294967280  ;;  %s19_s17 = sadd.s32 1, %s1999_s17   ;;  %s3429_s12 = smov %s1983_s13 }
 0x35d   : > { %p16_p4 = scmp.ge.s32.totalorder %s19_s17, 4   ;;  %s3430_s13 = smov %s1987_s14 }
 0x35e   : > { %s3431_s14 = smov %s2082_s26  ;;  %s3432_s15 = smov %s1995_s16 }
 0x35f   : > { %s3433_s16 = smov %s3435_s20  ;;  %18 = sbr.rel (!%p16_p4) target bundleno = 6 (0x6), region = 87 }
 0x366   :  { %1549 = vsyncpa [#allocation3], 1 }
 0x367   :  { %1551 = vsyncpa [#allocation3 + $0x1], 1 }
 0x368   :  { %1552 = vsyncpa [#allocation4], 1 }
 0x369   :  { %1554 = vsyncpa [#allocation4 + $0x1], 1 }

</bundles_post_ra>
